<compile_context>
chip_gen: v7x
topology: tpu7x:2x2x1
jax: 0.10.0
libtpu: 0.0.40
codegen_flags: <defaults>
</compile_context>

<pallas_src>
import jax
import jax.numpy as jnp
import numpy as np
from jax import lax
from jax.experimental import pallas as pl
from jax.experimental.pallas import tpu as pltpu

HIDDEN = 128        # hidden_dim
LABELS = 49         # label_size
LABELS_PAD = 128    # lane-dense padded label axis
INPUT_DIM = 75      # input_dim
EMB_DIM = 64        # embedding output
INPUT_PAD = 128     # lane-aligned pad of INPUT_DIM
SEQ_LEN = 8         # example sequence length

SIG_W = 3 * HIDDEN  # contiguous sigmoid slab width (gates i, f, o)


def lstm_classifier_kernel(x_ref, wfused_ref, bfused_ref, whh_ref,
                           wfc_ref, bfc_ref, out_ref, gx_ref):
    T = x_ref.shape[0]
    H = HIDDEN

    # All input-gate contributions in one MXU shot (bf16 operands, f32 acc):
    # (T, 128) @ (128, 4H) + (1, 4H) -> (T, 4H) f32 scratch.
    gx_ref[...] = (
        jnp.dot(x_ref[...], wfused_ref[...], preferred_element_type=jnp.float32)
        + bfused_ref[...])

    def step(t, carry):
        h, c = carry
        # Single fused recurrent matmul: (1,128) bf16 @ (128,512) bf16 -> f32.
        pre = (gx_ref[pl.ds(t, 1), :]
               + jnp.dot(h.astype(jnp.bfloat16), whh_ref[...],
                         preferred_element_type=jnp.float32))        # (1, 4H)
        # Gate layout (permuted at init): [ i | f | o | g ].
        sig = jax.nn.sigmoid(pre[:, :SIG_W])     # one EUP slab: i, f, o
        g = jnp.tanh(pre[:, SIG_W:])             # (1, H)
        i = sig[:, 0 * H:1 * H]
        f = sig[:, 1 * H:2 * H]
        o = sig[:, 2 * H:3 * H]
        c_new = f * c + i * g
        h_new = o * jnp.tanh(c_new)
        return (h_new, c_new)

    h0 = jnp.zeros((1, H), jnp.float32)
    c0 = jnp.zeros((1, H), jnp.float32)
    # Fully unrolled: T is static and the carry is tiny (two 128-wide rows).
    h_last, _ = lax.fori_loop(0, T, step, (h0, c0), unroll=True)

    # FC on lstm_out[-1] + log_softmax over the (padded, lane-dense) label
    # axis.  Padded columns carry a -1e30 bias so they vanish in the LSE.
    logits = (jnp.dot(h_last.astype(jnp.bfloat16), wfc_ref[...],
                      preferred_element_type=jnp.float32)
              + bfc_ref[...])                                         # (1, 128)
    m = jnp.max(logits, axis=-1, keepdims=True)
    lse = jnp.log(jnp.sum(jnp.exp(logits - m), axis=-1, keepdims=True)) + m
    out_ref[...] = logits - lse


def lstm_classifier_forward(x, params):
    T = x.shape[0]
    x2d = x.reshape(T, INPUT_DIM).astype(jnp.float32)
    x_pad = jnp.pad(x2d, ((0, 0), (0, INPUT_PAD - INPUT_DIM)))
    x_bf16 = x_pad.astype(jnp.bfloat16)

    args = (x_bf16, params["w_fused"], params["b_fused"], params["w_hh_t"],
            params["w_fc_t_pad"], params["b_fc_pad"])
    vmem = pl.BlockSpec(memory_space=pltpu.MemorySpace.VMEM)

    out = pl.pallas_call(
        lstm_classifier_kernel,
        out_shape=jax.ShapeDtypeStruct((1, LABELS_PAD), jnp.float32),
        in_specs=[vmem] * len(args),
        out_specs=vmem,
        scratch_shapes=[pltpu.VMEM((T, 4 * HIDDEN), jnp.float32)],
    )(*args)
    return out[:, :LABELS]


def _permute_gate_cols(m):
    """Reorder 4H gate columns from PyTorch [i|f|g|o] to [i|f|o|g]."""
    H = HIDDEN
    return jnp.concatenate(
        [m[:, 0 * H:1 * H], m[:, 1 * H:2 * H],
         m[:, 3 * H:4 * H], m[:, 2 * H:3 * H]], axis=1)


def init_params(key):
    ks = jax.random.split(key, 8)

    def u(k, shape, fan_in):
        bound = 1.0 / np.sqrt(fan_in)
        return jax.random.uniform(k, shape, jnp.float32, -bound, bound)

    # nn.Linear(75, 64)
    w_emb = u(ks[0], (EMB_DIM, INPUT_DIM), INPUT_DIM)
    b_emb = u(ks[1], (1, EMB_DIM), INPUT_DIM)
    # nn.LSTM(64, 128): weight_ih_l0 (4H, 64), weight_hh_l0 (4H, H), biases (4H,)
    w_ih = u(ks[2], (4 * HIDDEN, EMB_DIM), HIDDEN)
    w_hh = u(ks[3], (4 * HIDDEN, HIDDEN), HIDDEN)
    b_ih = u(ks[4], (1, 4 * HIDDEN), HIDDEN)
    b_hh = u(ks[5], (1, 4 * HIDDEN), HIDDEN)
    # nn.Linear(128, 49)
    w_fc = u(ks[6], (LABELS, HIDDEN), HIDDEN)
    b_fc = u(ks[7], (1, LABELS), HIDDEN)

    # Fold the embedding Linear into the LSTM input weights (exact in f32).
    w_emb_t_pad = jnp.zeros((INPUT_PAD, EMB_DIM), jnp.float32).at[
        :INPUT_DIM].set(w_emb.T)
    w_fused = w_emb_t_pad @ w_ih.T                       # (128, 512)
    b_fused = b_emb @ w_ih.T + b_ih + b_hh               # (1, 512)

    # Permute gate columns to [i, f, o, g] so the sigmoid gates are one
    # contiguous 384-wide slab inside the kernel.
    w_fused = _permute_gate_cols(w_fused)
    b_fused = _permute_gate_cols(b_fused)
    w_hh_t = _permute_gate_cols(w_hh.T)                  # (128, 512)

    # Lane-dense FC: pad to 128 output columns; padded logits biased to -1e30
    # so they contribute nothing to the log-sum-exp.
    w_fc_t_pad = jnp.zeros((HIDDEN, LABELS_PAD), jnp.float32).at[
        :, :LABELS].set(w_fc.T)
    b_fc_pad = jnp.full((1, LABELS_PAD), -1e30, jnp.float32).at[
        :, :LABELS].set(b_fc)

    return dict(
        # raw (f32) params for the reference path
        w_emb=w_emb, b_emb=b_emb,
        w_ih=w_ih, w_hh=w_hh, b_ih=b_ih, b_hh=b_hh,
        w_fc=w_fc, b_fc=b_fc,
        # kernel operands: bf16 matmul weights, f32 biases
        w_fused=w_fused.astype(jnp.bfloat16),
        b_fused=b_fused,
        w_hh_t=w_hh_t.astype(jnp.bfloat16),
        w_fc_t_pad=w_fc_t_pad.astype(jnp.bfloat16),
        b_fc_pad=b_fc_pad)


def reference_forward(x, params):
    """Pure-JAX f32 reference matching the PyTorch forward pass (unfused)."""
    T = x.shape[0]
    emb = x.reshape(T, INPUT_DIM) @ params["w_emb"].T + params["b_emb"][0]
    H = HIDDEN
    h = jnp.zeros((H,), jnp.float32)
    c = jnp.zeros((H,), jnp.float32)
    bias = params["b_ih"][0] + params["b_hh"][0]
    for t in range(T):
        gates = params["w_ih"] @ emb[t] + params["w_hh"] @ h + bias
        i = jax.nn.sigmoid(gates[0 * H:1 * H])
        f = jax.nn.sigmoid(gates[1 * H:2 * H])
        g = jnp.tanh(gates[2 * H:3 * H])
        o = jax.nn.sigmoid(gates[3 * H:4 * H])
        c = f * c + i * g
        h = o * jnp.tanh(c)
    y = params["w_fc"] @ h + params["b_fc"][0]
    return jax.nn.log_softmax(y)[None, :]


if __name__ == "__main__":
    key = jax.random.PRNGKey(0)
    pkey, xkey = jax.random.split(key)
    params = init_params(pkey)
    # input: (seq_len, 75) — forward's input.view(input.size()[0], 75)
    x = jax.random.normal(xkey, (SEQ_LEN, INPUT_DIM), jnp.float32)

    fwd = jax.jit(lstm_classifier_forward)
    out = jax.block_until_ready(fwd(x, params))

    ref = reference_forward(x, params)
    assert out.shape == (1, LABELS)
    # bf16 MXU operands (f32 accumulation): loosened tolerance vs. pure-f32 ref.
    np.testing.assert_allclose(np.asarray(out), np.asarray(ref),
                               rtol=2e-2, atol=2e-2)
    print("KERNEL_OK")
</pallas_src>

<mosaic_0001>
module attributes {stable_mosaic.version = 11 : i64} {
  func.func @lstm_classifier_kernel(%arg0: memref<8x128xbf16, #tpu.memory_space<vmem>>, %arg1: memref<128x512xbf16, #tpu.memory_space<vmem>>, %arg2: memref<1x512xf32, #tpu.memory_space<vmem>>, %arg3: memref<128x512xbf16, #tpu.memory_space<vmem>>, %arg4: memref<128x128xbf16, #tpu.memory_space<vmem>>, %arg5: memref<1x128xf32, #tpu.memory_space<vmem>>, %arg6: memref<1x128xf32, #tpu.memory_space<vmem>>, %arg7: memref<8x512xf32, #tpu.memory_space<vmem>>) attributes {dimension_semantics = [], scalar_prefetch = 0 : i64, scratch_operands = 1 : i64, tpu.core_type = #tpu.core_type<tc>} {
    %c0 = arith.constant 0 : index
    %c0_0 = arith.constant 0 : index
    %0 = vector.load %arg0[%c0, %c0_0] : memref<8x128xbf16, #tpu.memory_space<vmem>>, vector<8x128xbf16>
    %c0_1 = arith.constant 0 : index
    %c0_2 = arith.constant 0 : index
    %1 = vector.load %arg1[%c0_1, %c0_2] : memref<128x512xbf16, #tpu.memory_space<vmem>>, vector<128x512xbf16>
    %cst = arith.constant dense<0.000000e+00> : vector<8x512xf32>
    %2 = tpu.matmul %0, %1, %cst {dimension_numbers = #tpu.dot_dimension_numbers<[1], [0], [0], [1], [0, 0, 1, 1], [], []>} : vector<8x128xbf16>, vector<128x512xbf16>, vector<8x512xf32> -> vector<8x512xf32>
    %c0_3 = arith.constant 0 : index
    %c0_4 = arith.constant 0 : index
    %3 = vector.load %arg2[%c0_3, %c0_4] : memref<1x512xf32, #tpu.memory_space<vmem>>, vector<1x512xf32>
    %4 = vector.broadcast %3 : vector<1x512xf32> to vector<8x512xf32>
    %5 = arith.addf %2, %4 : vector<8x512xf32>
    %c0_5 = arith.constant 0 : index
    %c0_6 = arith.constant 0 : index
    %6 = vector.load %arg7[%c0_5, %c0_6] : memref<8x512xf32, #tpu.memory_space<vmem>>, vector<8x512xf32>
    tpu.vector_store %arg7[%c0_5, %c0_6], %5 {strides = array<i32>} : memref<8x512xf32, #tpu.memory_space<vmem>>, vector<8x512xf32>,
    %cst_7 = arith.constant 0.000000e+00 : f32
    %7 = vector.broadcast %cst_7 : f32 to vector<1x128xf32>
    %cst_8 = arith.constant 0.000000e+00 : f32
    %8 = vector.broadcast %cst_8 : f32 to vector<1x128xf32>
    %c0_i32 = arith.constant 0 : i32
    %9 = arith.index_cast %c0_i32 : i32 to index
    %c0_9 = arith.constant 0 : index
    %10 = vector.load %arg7[%9, %c0_9] : memref<8x512xf32, #tpu.memory_space<vmem>>, vector<1x512xf32>
    %11 = arith.truncf %7 : vector<1x128xf32> to vector<1x128xbf16>
    %c0_10 = arith.constant 0 : index
    %c0_11 = arith.constant 0 : index
    %12 = vector.load %arg3[%c0_10, %c0_11] : memref<128x512xbf16, #tpu.memory_space<vmem>>, vector<128x512xbf16>
    %cst_12 = arith.constant dense<0.000000e+00> : vector<1x512xf32>
    %13 = tpu.matmul %11, %12, %cst_12 {dimension_numbers = #tpu.dot_dimension_numbers<[1], [0], [0], [1], [0, 0, 1, 1], [], []>} : vector<1x128xbf16>, vector<128x512xbf16>, vector<1x512xf32> -> vector<1x512xf32>
    %14 = arith.addf %10, %13 : vector<1x512xf32>
    %15 = vector.extract_strided_slice %14 {offsets = [0, 0], sizes = [1, 384], strides = [1, 1]} : vector<1x512xf32> to vector<1x384xf32>
    %16 = arith.negf %15 : vector<1x384xf32>
    %17 = math.exp %16 : vector<1x384xf32>
    %cst_13 = arith.constant 1.000000e+00 : f32
    %18 = vector.broadcast %cst_13 : f32 to vector<1x384xf32>
    %19 = arith.addf %18, %17 : vector<1x384xf32>
    %20 = arith.divf %18, %19 : vector<1x384xf32>
    %21 = vector.extract_strided_slice %14 {offsets = [0, 384], sizes = [1, 128], strides = [1, 1]} : vector<1x512xf32> to vector<1x128xf32>
    %22 = math.tanh %21 : vector<1x128xf32>
    %23 = vector.extract_strided_slice %20 {offsets = [0, 0], sizes = [1, 128], strides = [1, 1]} : vector<1x384xf32> to vector<1x128xf32>
    %24 = vector.extract_strided_slice %20 {offsets = [0, 128], sizes = [1, 128], strides = [1, 1]} : vector<1x384xf32> to vector<1x128xf32>
    %25 = vector.extract_strided_slice %20 {offsets = [0, 256], sizes = [1, 128], strides = [1, 1]} : vector<1x384xf32> to vector<1x128xf32>
    %26 = arith.mulf %24, %8 : vector<1x128xf32>
    %27 = arith.mulf %23, %22 : vector<1x128xf32>
    %28 = arith.addf %26, %27 : vector<1x128xf32>
    %29 = math.tanh %28 : vector<1x128xf32>
    %30 = arith.mulf %25, %29 : vector<1x128xf32>
    %c1_i32 = arith.constant 1 : i32
    %31 = arith.index_cast %c1_i32 : i32 to index
    %c0_14 = arith.constant 0 : index
    %32 = vector.load %arg7[%31, %c0_14] : memref<8x512xf32, #tpu.memory_space<vmem>>, vector<1x512xf32>
    %33 = arith.truncf %30 : vector<1x128xf32> to vector<1x128xbf16>
    %c0_15 = arith.constant 0 : index
    %c0_16 = arith.constant 0 : index
    %34 = vector.load %arg3[%c0_15, %c0_16] : memref<128x512xbf16, #tpu.memory_space<vmem>>, vector<128x512xbf16>
    %cst_17 = arith.constant dense<0.000000e+00> : vector<1x512xf32>
    %35 = tpu.matmul %33, %34, %cst_17 {dimension_numbers = #tpu.dot_dimension_numbers<[1], [0], [0], [1], [0, 0, 1, 1], [], []>} : vector<1x128xbf16>, vector<128x512xbf16>, vector<1x512xf32> -> vector<1x512xf32>
    %36 = arith.addf %32, %35 : vector<1x512xf32>
    %37 = vector.extract_strided_slice %36 {offsets = [0, 0], sizes = [1, 384], strides = [1, 1]} : vector<1x512xf32> to vector<1x384xf32>
    %38 = arith.negf %37 : vector<1x384xf32>
    %39 = math.exp %38 : vector<1x384xf32>
    %cst_18 = arith.constant 1.000000e+00 : f32
    %40 = vector.broadcast %cst_18 : f32 to vector<1x384xf32>
    %41 = arith.addf %40, %39 : vector<1x384xf32>
    %42 = arith.divf %40, %41 : vector<1x384xf32>
    %43 = vector.extract_strided_slice %36 {offsets = [0, 384], sizes = [1, 128], strides = [1, 1]} : vector<1x512xf32> to vector<1x128xf32>
    %44 = math.tanh %43 : vector<1x128xf32>
    %45 = vector.extract_strided_slice %42 {offsets = [0, 0], sizes = [1, 128], strides = [1, 1]} : vector<1x384xf32> to vector<1x128xf32>
    %46 = vector.extract_strided_slice %42 {offsets = [0, 128], sizes = [1, 128], strides = [1, 1]} : vector<1x384xf32> to vector<1x128xf32>
    %47 = vector.extract_strided_slice %42 {offsets = [0, 256], sizes = [1, 128], strides = [1, 1]} : vector<1x384xf32> to vector<1x128xf32>
    %48 = arith.mulf %46, %28 : vector<1x128xf32>
    %49 = arith.mulf %45, %44 : vector<1x128xf32>
    %50 = arith.addf %48, %49 : vector<1x128xf32>
    %51 = math.tanh %50 : vector<1x128xf32>
    %52 = arith.mulf %47, %51 : vector<1x128xf32>
    %c2_i32 = arith.constant 2 : i32
    %53 = arith.index_cast %c2_i32 : i32 to index
    %c0_19 = arith.constant 0 : index
    %54 = vector.load %arg7[%53, %c0_19] : memref<8x512xf32, #tpu.memory_space<vmem>>, vector<1x512xf32>
    %55 = arith.truncf %52 : vector<1x128xf32> to vector<1x128xbf16>
    %c0_20 = arith.constant 0 : index
    %c0_21 = arith.constant 0 : index
    %56 = vector.load %arg3[%c0_20, %c0_21] : memref<128x512xbf16, #tpu.memory_space<vmem>>, vector<128x512xbf16>
    %cst_22 = arith.constant dense<0.000000e+00> : vector<1x512xf32>
    %57 = tpu.matmul %55, %56, %cst_22 {dimension_numbers = #tpu.dot_dimension_numbers<[1], [0], [0], [1], [0, 0, 1, 1], [], []>} : vector<1x128xbf16>, vector<128x512xbf16>, vector<1x512xf32> -> vector<1x512xf32>
    %58 = arith.addf %54, %57 : vector<1x512xf32>
    %59 = vector.extract_strided_slice %58 {offsets = [0, 0], sizes = [1, 384], strides = [1, 1]} : vector<1x512xf32> to vector<1x384xf32>
    %60 = arith.negf %59 : vector<1x384xf32>
    %61 = math.exp %60 : vector<1x384xf32>
    %cst_23 = arith.constant 1.000000e+00 : f32
    %62 = vector.broadcast %cst_23 : f32 to vector<1x384xf32>
    %63 = arith.addf %62, %61 : vector<1x384xf32>
    %64 = arith.divf %62, %63 : vector<1x384xf32>
    %65 = vector.extract_strided_slice %58 {offsets = [0, 384], sizes = [1, 128], strides = [1, 1]} : vector<1x512xf32> to vector<1x128xf32>
    %66 = math.tanh %65 : vector<1x128xf32>
    %67 = vector.extract_strided_slice %64 {offsets = [0, 0], sizes = [1, 128], strides = [1, 1]} : vector<1x384xf32> to vector<1x128xf32>
    %68 = vector.extract_strided_slice %64 {offsets = [0, 128], sizes = [1, 128], strides = [1, 1]} : vector<1x384xf32> to vector<1x128xf32>
    %69 = vector.extract_strided_slice %64 {offsets = [0, 256], sizes = [1, 128], strides = [1, 1]} : vector<1x384xf32> to vector<1x128xf32>
    %70 = arith.mulf %68, %50 : vector<1x128xf32>
    %71 = arith.mulf %67, %66 : vector<1x128xf32>
    %72 = arith.addf %70, %71 : vector<1x128xf32>
    %73 = math.tanh %72 : vector<1x128xf32>
    %74 = arith.mulf %69, %73 : vector<1x128xf32>
    %c3_i32 = arith.constant 3 : i32
    %75 = arith.index_cast %c3_i32 : i32 to index
    %c0_24 = arith.constant 0 : index
    %76 = vector.load %arg7[%75, %c0_24] : memref<8x512xf32, #tpu.memory_space<vmem>>, vector<1x512xf32>
    %77 = arith.truncf %74 : vector<1x128xf32> to vector<1x128xbf16>
    %c0_25 = arith.constant 0 : index
    %c0_26 = arith.constant 0 : index
    %78 = vector.load %arg3[%c0_25, %c0_26] : memref<128x512xbf16, #tpu.memory_space<vmem>>, vector<128x512xbf16>
    %cst_27 = arith.constant dense<0.000000e+00> : vector<1x512xf32>
    %79 = tpu.matmul %77, %78, %cst_27 {dimension_numbers = #tpu.dot_dimension_numbers<[1], [0], [0], [1], [0, 0, 1, 1], [], []>} : vector<1x128xbf16>, vector<128x512xbf16>, vector<1x512xf32> -> vector<1x512xf32>
    %80 = arith.addf %76, %79 : vector<1x512xf32>
    %81 = vector.extract_strided_slice %80 {offsets = [0, 0], sizes = [1, 384], strides = [1, 1]} : vector<1x512xf32> to vector<1x384xf32>
    %82 = arith.negf %81 : vector<1x384xf32>
    %83 = math.exp %82 : vector<1x384xf32>
    %cst_28 = arith.constant 1.000000e+00 : f32
    %84 = vector.broadcast %cst_28 : f32 to vector<1x384xf32>
    %85 = arith.addf %84, %83 : vector<1x384xf32>
    %86 = arith.divf %84, %85 : vector<1x384xf32>
    %87 = vector.extract_strided_slice %80 {offsets = [0, 384], sizes = [1, 128], strides = [1, 1]} : vector<1x512xf32> to vector<1x128xf32>
    %88 = math.tanh %87 : vector<1x128xf32>
    %89 = vector.extract_strided_slice %86 {offsets = [0, 0], sizes = [1, 128], strides = [1, 1]} : vector<1x384xf32> to vector<1x128xf32>
    %90 = vector.extract_strided_slice %86 {offsets = [0, 128], sizes = [1, 128], strides = [1, 1]} : vector<1x384xf32> to vector<1x128xf32>
    %91 = vector.extract_strided_slice %86 {offsets = [0, 256], sizes = [1, 128], strides = [1, 1]} : vector<1x384xf32> to vector<1x128xf32>
    %92 = arith.mulf %90, %72 : vector<1x128xf32>
    %93 = arith.mulf %89, %88 : vector<1x128xf32>
    %94 = arith.addf %92, %93 : vector<1x128xf32>
    %95 = math.tanh %94 : vector<1x128xf32>
    %96 = arith.mulf %91, %95 : vector<1x128xf32>
    %c4_i32 = arith.constant 4 : i32
    %97 = arith.index_cast %c4_i32 : i32 to index
    %c0_29 = arith.constant 0 : index
    %98 = vector.load %arg7[%97, %c0_29] : memref<8x512xf32, #tpu.memory_space<vmem>>, vector<1x512xf32>
    %99 = arith.truncf %96 : vector<1x128xf32> to vector<1x128xbf16>
    %c0_30 = arith.constant 0 : index
    %c0_31 = arith.constant 0 : index
    %100 = vector.load %arg3[%c0_30, %c0_31] : memref<128x512xbf16, #tpu.memory_space<vmem>>, vector<128x512xbf16>
    %cst_32 = arith.constant dense<0.000000e+00> : vector<1x512xf32>
    %101 = tpu.matmul %99, %100, %cst_32 {dimension_numbers = #tpu.dot_dimension_numbers<[1], [0], [0], [1], [0, 0, 1, 1], [], []>} : vector<1x128xbf16>, vector<128x512xbf16>, vector<1x512xf32> -> vector<1x512xf32>
    %102 = arith.addf %98, %101 : vector<1x512xf32>
    %103 = vector.extract_strided_slice %102 {offsets = [0, 0], sizes = [1, 384], strides = [1, 1]} : vector<1x512xf32> to vector<1x384xf32>
    %104 = arith.negf %103 : vector<1x384xf32>
    %105 = math.exp %104 : vector<1x384xf32>
    %cst_33 = arith.constant 1.000000e+00 : f32
    %106 = vector.broadcast %cst_33 : f32 to vector<1x384xf32>
    %107 = arith.addf %106, %105 : vector<1x384xf32>
    %108 = arith.divf %106, %107 : vector<1x384xf32>
    %109 = vector.extract_strided_slice %102 {offsets = [0, 384], sizes = [1, 128], strides = [1, 1]} : vector<1x512xf32> to vector<1x128xf32>
    %110 = math.tanh %109 : vector<1x128xf32>
    %111 = vector.extract_strided_slice %108 {offsets = [0, 0], sizes = [1, 128], strides = [1, 1]} : vector<1x384xf32> to vector<1x128xf32>
    %112 = vector.extract_strided_slice %108 {offsets = [0, 128], sizes = [1, 128], strides = [1, 1]} : vector<1x384xf32> to vector<1x128xf32>
    %113 = vector.extract_strided_slice %108 {offsets = [0, 256], sizes = [1, 128], strides = [1, 1]} : vector<1x384xf32> to vector<1x128xf32>
    %114 = arith.mulf %112, %94 : vector<1x128xf32>
    %115 = arith.mulf %111, %110 : vector<1x128xf32>
    %116 = arith.addf %114, %115 : vector<1x128xf32>
    %117 = math.tanh %116 : vector<1x128xf32>
    %118 = arith.mulf %113, %117 : vector<1x128xf32>
    %c5_i32 = arith.constant 5 : i32
    %119 = arith.index_cast %c5_i32 : i32 to index
    %c0_34 = arith.constant 0 : index
    %120 = vector.load %arg7[%119, %c0_34] : memref<8x512xf32, #tpu.memory_space<vmem>>, vector<1x512xf32>
    %121 = arith.truncf %118 : vector<1x128xf32> to vector<1x128xbf16>
    %c0_35 = arith.constant 0 : index
    %c0_36 = arith.constant 0 : index
    %122 = vector.load %arg3[%c0_35, %c0_36] : memref<128x512xbf16, #tpu.memory_space<vmem>>, vector<128x512xbf16>
    %cst_37 = arith.constant dense<0.000000e+00> : vector<1x512xf32>
    %123 = tpu.matmul %121, %122, %cst_37 {dimension_numbers = #tpu.dot_dimension_numbers<[1], [0], [0], [1], [0, 0, 1, 1], [], []>} : vector<1x128xbf16>, vector<128x512xbf16>, vector<1x512xf32> -> vector<1x512xf32>
    %124 = arith.addf %120, %123 : vector<1x512xf32>
    %125 = vector.extract_strided_slice %124 {offsets = [0, 0], sizes = [1, 384], strides = [1, 1]} : vector<1x512xf32> to vector<1x384xf32>
    %126 = arith.negf %125 : vector<1x384xf32>
    %127 = math.exp %126 : vector<1x384xf32>
    %cst_38 = arith.constant 1.000000e+00 : f32
    %128 = vector.broadcast %cst_38 : f32 to vector<1x384xf32>
    %129 = arith.addf %128, %127 : vector<1x384xf32>
    %130 = arith.divf %128, %129 : vector<1x384xf32>
    %131 = vector.extract_strided_slice %124 {offsets = [0, 384], sizes = [1, 128], strides = [1, 1]} : vector<1x512xf32> to vector<1x128xf32>
    %132 = math.tanh %131 : vector<1x128xf32>
    %133 = vector.extract_strided_slice %130 {offsets = [0, 0], sizes = [1, 128], strides = [1, 1]} : vector<1x384xf32> to vector<1x128xf32>
    %134 = vector.extract_strided_slice %130 {offsets = [0, 128], sizes = [1, 128], strides = [1, 1]} : vector<1x384xf32> to vector<1x128xf32>
    %135 = vector.extract_strided_slice %130 {offsets = [0, 256], sizes = [1, 128], strides = [1, 1]} : vector<1x384xf32> to vector<1x128xf32>
    %136 = arith.mulf %134, %116 : vector<1x128xf32>
    %137 = arith.mulf %133, %132 : vector<1x128xf32>
    %138 = arith.addf %136, %137 : vector<1x128xf32>
    %139 = math.tanh %138 : vector<1x128xf32>
    %140 = arith.mulf %135, %139 : vector<1x128xf32>
    %c6_i32 = arith.constant 6 : i32
    %141 = arith.index_cast %c6_i32 : i32 to index
    %c0_39 = arith.constant 0 : index
    %142 = vector.load %arg7[%141, %c0_39] : memref<8x512xf32, #tpu.memory_space<vmem>>, vector<1x512xf32>
    %143 = arith.truncf %140 : vector<1x128xf32> to vector<1x128xbf16>
    %c0_40 = arith.constant 0 : index
    %c0_41 = arith.constant 0 : index
    %144 = vector.load %arg3[%c0_40, %c0_41] : memref<128x512xbf16, #tpu.memory_space<vmem>>, vector<128x512xbf16>
    %cst_42 = arith.constant dense<0.000000e+00> : vector<1x512xf32>
    %145 = tpu.matmul %143, %144, %cst_42 {dimension_numbers = #tpu.dot_dimension_numbers<[1], [0], [0], [1], [0, 0, 1, 1], [], []>} : vector<1x128xbf16>, vector<128x512xbf16>, vector<1x512xf32> -> vector<1x512xf32>
    %146 = arith.addf %142, %145 : vector<1x512xf32>
    %147 = vector.extract_strided_slice %146 {offsets = [0, 0], sizes = [1, 384], strides = [1, 1]} : vector<1x512xf32> to vector<1x384xf32>
    %148 = arith.negf %147 : vector<1x384xf32>
    %149 = math.exp %148 : vector<1x384xf32>
    %cst_43 = arith.constant 1.000000e+00 : f32
    %150 = vector.broadcast %cst_43 : f32 to vector<1x384xf32>
    %151 = arith.addf %150, %149 : vector<1x384xf32>
    %152 = arith.divf %150, %151 : vector<1x384xf32>
    %153 = vector.extract_strided_slice %146 {offsets = [0, 384], sizes = [1, 128], strides = [1, 1]} : vector<1x512xf32> to vector<1x128xf32>
    %154 = math.tanh %153 : vector<1x128xf32>
    %155 = vector.extract_strided_slice %152 {offsets = [0, 0], sizes = [1, 128], strides = [1, 1]} : vector<1x384xf32> to vector<1x128xf32>
    %156 = vector.extract_strided_slice %152 {offsets = [0, 128], sizes = [1, 128], strides = [1, 1]} : vector<1x384xf32> to vector<1x128xf32>
    %157 = vector.extract_strided_slice %152 {offsets = [0, 256], sizes = [1, 128], strides = [1, 1]} : vector<1x384xf32> to vector<1x128xf32>
    %158 = arith.mulf %156, %138 : vector<1x128xf32>
    %159 = arith.mulf %155, %154 : vector<1x128xf32>
    %160 = arith.addf %158, %159 : vector<1x128xf32>
    %161 = math.tanh %160 : vector<1x128xf32>
    %162 = arith.mulf %157, %161 : vector<1x128xf32>
    %c7_i32 = arith.constant 7 : i32
    %163 = arith.index_cast %c7_i32 : i32 to index
    %c0_44 = arith.constant 0 : index
    %164 = vector.load %arg7[%163, %c0_44] : memref<8x512xf32, #tpu.memory_space<vmem>>, vector<1x512xf32>
    %165 = arith.truncf %162 : vector<1x128xf32> to vector<1x128xbf16>
    %c0_45 = arith.constant 0 : index
    %c0_46 = arith.constant 0 : index
    %166 = vector.load %arg3[%c0_45, %c0_46] : memref<128x512xbf16, #tpu.memory_space<vmem>>, vector<128x512xbf16>
    %cst_47 = arith.constant dense<0.000000e+00> : vector<1x512xf32>
    %167 = tpu.matmul %165, %166, %cst_47 {dimension_numbers = #tpu.dot_dimension_numbers<[1], [0], [0], [1], [0, 0, 1, 1], [], []>} : vector<1x128xbf16>, vector<128x512xbf16>, vector<1x512xf32> -> vector<1x512xf32>
    %168 = arith.addf %164, %167 : vector<1x512xf32>
    %169 = vector.extract_strided_slice %168 {offsets = [0, 0], sizes = [1, 384], strides = [1, 1]} : vector<1x512xf32> to vector<1x384xf32>
    %170 = arith.negf %169 : vector<1x384xf32>
    %171 = math.exp %170 : vector<1x384xf32>
    %cst_48 = arith.constant 1.000000e+00 : f32
    %172 = vector.broadcast %cst_48 : f32 to vector<1x384xf32>
    %173 = arith.addf %172, %171 : vector<1x384xf32>
    %174 = arith.divf %172, %173 : vector<1x384xf32>
    %175 = vector.extract_strided_slice %168 {offsets = [0, 384], sizes = [1, 128], strides = [1, 1]} : vector<1x512xf32> to vector<1x128xf32>
    %176 = math.tanh %175 : vector<1x128xf32>
    %177 = vector.extract_strided_slice %174 {offsets = [0, 0], sizes = [1, 128], strides = [1, 1]} : vector<1x384xf32> to vector<1x128xf32>
    %178 = vector.extract_strided_slice %174 {offsets = [0, 128], sizes = [1, 128], strides = [1, 1]} : vector<1x384xf32> to vector<1x128xf32>
    %179 = vector.extract_strided_slice %174 {offsets = [0, 256], sizes = [1, 128], strides = [1, 1]} : vector<1x384xf32> to vector<1x128xf32>
    %180 = arith.mulf %178, %160 : vector<1x128xf32>
    %181 = arith.mulf %177, %176 : vector<1x128xf32>
    %182 = arith.addf %180, %181 : vector<1x128xf32>
    %183 = math.tanh %182 : vector<1x128xf32>
    %184 = arith.mulf %179, %183 : vector<1x128xf32>
    %c8_i32 = arith.constant 8 : i32
    %185 = arith.truncf %184 : vector<1x128xf32> to vector<1x128xbf16>
    %c0_49 = arith.constant 0 : index
    %c0_50 = arith.constant 0 : index
    %186 = vector.load %arg4[%c0_49, %c0_50] : memref<128x128xbf16, #tpu.memory_space<vmem>>, vector<128x128xbf16>
    %cst_51 = arith.constant dense<0.000000e+00> : vector<1x128xf32>
    %187 = tpu.matmul %185, %186, %cst_51 {dimension_numbers = #tpu.dot_dimension_numbers<[1], [0], [0], [1], [0, 0, 1, 1], [], []>} : vector<1x128xbf16>, vector<128x128xbf16>, vector<1x128xf32> -> vector<1x128xf32>
    %c0_52 = arith.constant 0 : index
    %c0_53 = arith.constant 0 : index
    %188 = vector.load %arg5[%c0_52, %c0_53] : memref<1x128xf32, #tpu.memory_space<vmem>>, vector<1x128xf32>
    %189 = arith.addf %187, %188 : vector<1x128xf32>
    %cst_54 = arith.constant dense<0xFF800000> : vector<1xf32>
    %190 = vector.multi_reduction <maximumf>, %189, %cst_54 [1] : vector<1x128xf32> to vector<1xf32>
    %191 = vector.shape_cast %190 : vector<1xf32> to vector<1x1xf32>
    %192 = vector.broadcast %191 : vector<1x1xf32> to vector<1x128xf32>
    %193 = arith.subf %189, %192 : vector<1x128xf32>
    %194 = math.exp %193 : vector<1x128xf32>
    %cst_55 = arith.constant dense<0.000000e+00> : vector<1xf32>
    %195 = vector.multi_reduction <add>, %194, %cst_55 [1] : vector<1x128xf32> to vector<1xf32>
    %196 = vector.shape_cast %195 : vector<1xf32> to vector<1x1xf32>
    %197 = math.log %196 : vector<1x1xf32>
    %198 = arith.addf %197, %191 : vector<1x1xf32>
    %199 = vector.broadcast %198 : vector<1x1xf32> to vector<1x128xf32>
    %200 = arith.subf %189, %199 : vector<1x128xf32>
    %c0_56 = arith.constant 0 : index
    %c0_57 = arith.constant 0 : index
    %201 = vector.load %arg6[%c0_56, %c0_57] : memref<1x128xf32, #tpu.memory_space<vmem>>, vector<1x128xf32>
    tpu.vector_store %arg6[%c0_56, %c0_57], %200 {strides = array<i32>} : memref<1x128xf32, #tpu.memory_space<vmem>>, vector<1x128xf32>,
    return
  }
}

</mosaic_0001>

<bundles_post_ra>
// kernel: lstm_classifier_forward.1
= control target key start
LH: loop header
LB: loop body
LE: loop exit
PB: predicated region body
PF: predicated region fallthrough
CT: control target
= control target key end

     0   :  { %11 = vsyncpa [#allocation4], 0  ;;  %s2662_s0 = inlined_call_operand.vmem [shape: bf16[8,128], index: 0, kind: input, shape index: {}]   ;;  %s2663_s1 = inlined_call_operand.hbm [shape: bf16[128,512], index: 1, kind: input, shape index: {}]   ;;  %s2664_s2 = inlined_call_operand.vmem [shape: f32[1,512], index: 2, kind: input, shape index: {}]   ;;  %s2665_s3 = inlined_call_operand.hbm [shape: bf16[128,512], index: 3, kind: input, shape index: {}]   ;;  %s2666_s4 = inlined_call_operand.hbm [shape: bf16[128,128], index: 4, kind: input, shape index: {}]   ;;  %s2667_s5 = inlined_call_operand.vmem [shape: f32[1,128], index: 5, kind: input, shape index: {}]   ;;  %s2668_s6 = inlined_call_operand.hbm [shape: f32[1,128], index: 6, kind: output, shape index: {}]  }
   0x1   :  { %12 = vsyncpa [#allocation7], 0 }
   0x2   :  { %13 = vsyncpa [#allocation5], 0  ;;  %s2180_s21 = smov [#allocation6]   ;;  %s2181_s23 = smov [#allocation3]  }
   0x3   :  { %s35_s22 = sshll.u32 %s2180_s21, 4  ;;  %s21_s24 = sshll.u32 %s2181_s23, 4  ;;  %s36_s22 = int_to_ptr.vmem [resolvable:$true] %s35_s22  ;;  %s2227_s24 = int_to_ptr.vmem [resolvable:$true] %s21_s24 }
   0x4   :  { %s2086_s27 = scalar_lea.hbm %s2665_s3, 4096 }
   0x5   :  { %p2087_p0 = scmp.ne.s32.totalorder %s2665_s3, %s2086_s27  ;;  %p2090_p1 = scmp.lt.u32.totalorder %s2086_s27, %s2665_s3 }
   0x7   :  { %p2092_p2 = pnand %p2090_p1, %p2087_p0 }
   0x9   :  { %2095 = shalt.err (!%p2092_p2)
}
   0xa   :  { %s2096_s8 = scalar_lea.vmem %s36_s22, 4096  ;;  %p2101_p4 = scmp.lt.s32.totalorder %s36_s22, %s36_s22 }
   0xb   :  { %p2097_p3 = scmp.ne.s32.totalorder %s36_s22, %s2096_s8  ;;  %p2102_p5 = scmp.lt.s32.totalorder %s2096_s8, %s2096_s8 }
   0xd   :  { %p2103_p6 = por %p2102_p5, %p2101_p4 }
   0xf   :  { %p2104_p7 = pnand %p2103_p6, %p2097_p3 }
  0x11   :  { %2107 = shalt.err (!%p2104_p7)
}
  0x12   :  { %s2182_s9 = smov 256   ;;  %s2183_s10 = smov 16  }
  0x13   :  { %41 = dma.hbm_to_vmem [thread:$0]  %s2665_s3, 4096, %s36_s22, [#allocation7], %s2182_s9, %s2182_s9, %s2183_s10  }
  0x14   :  { %s2108_s15 = scalar_lea.hbm %s2663_s1, 4096 }
  0x15   :  { %p2109_p8 = scmp.ne.s32.totalorder %s2663_s1, %s2108_s15  ;;  %p2112_p9 = scmp.lt.u32.totalorder %s2108_s15, %s2663_s1 }
  0x17   :  { %p2114_p10 = pnand %p2112_p9, %p2109_p8 }
  0x19   :  { %2117 = shalt.err (!%p2114_p10)
}
  0x1a   :  { %s2118_s20 = scalar_lea.vmem %s2227_s24, 4096  ;;  %p2123_p12 = scmp.lt.s32.totalorder %s2227_s24, %s2227_s24 }
  0x1b   :  { %p2119_p11 = scmp.ne.s32.totalorder %s2227_s24, %s2118_s20  ;;  %p2124_p13 = scmp.lt.s32.totalorder %s2118_s20, %s2118_s20 }
  0x1d   :  { %p2125_p0 = por %p2124_p13, %p2123_p12 }
  0x1f   :  { %p2126_p1 = pnand %p2125_p0, %p2119_p11 }
  0x21   :  { %2129 = shalt.err (!%p2126_p1)
}
  0x22   :  { %27 = dma.hbm_to_vmem [thread:$0]  %s2663_s1, 4096, %s2227_s24, [#allocation4], %s2182_s9, %s2182_s9, %s2183_s10  }
  0x23   :  { %s2184_s22 = smov [#allocation8]   ;;  %s2130_s27 = scalar_lea.hbm %s2666_s4, 1024 }
  0x24   :  { %s47_s23 = sshll.u32 %s2184_s22, 4  ;;  %p2131_p2 = scmp.ne.s32.totalorder %s2666_s4, %s2130_s27  ;;  %s48_s23 = int_to_ptr.vmem [resolvable:$true] %s47_s23 }
  0x25   :  { %p2134_p3 = scmp.lt.u32.totalorder %s2130_s27, %s2666_s4 }
  0x27   :  { %p2136_p4 = pnand %p2134_p3, %p2131_p2 }
  0x29   :  { %2139 = shalt.err (!%p2136_p4)
}
  0x2a   :  { %s2140_s8 = scalar_lea.vmem %s48_s23, 1024  ;;  %p2145_p6 = scmp.lt.s32.totalorder %s48_s23, %s48_s23 }
  0x2b   :  { %p2141_p5 = scmp.ne.s32.totalorder %s48_s23, %s2140_s8  ;;  %p2146_p7 = scmp.lt.s32.totalorder %s2140_s8, %s2140_s8 }
  0x2d   :  { %p2147_p8 = por %p2146_p7, %p2145_p6 }
  0x2f   :  { %p2148_p9 = pnand %p2147_p8, %p2141_p5 }
  0x31   :  { %2151 = shalt.err (!%p2148_p9)
}
  0x32   :  { %s2185_s1 = smov 64   ;;  %s2186_s24 = smov 4  }
  0x33   :  { %53 = dma.hbm_to_vmem [thread:$0]  %s2666_s4, 1024, %s48_s23, [#allocation7], %s2185_s1, %s2185_s1, %s2186_s24  }
  0x34   :  { %2174 = dma.done.wait [#allocation4], 4096  }
  0x35   :  { %2175 = vsyncadd [#allocation4], 4294963200 }
  0x36   :  { %2176 = dma.done.wait [#allocation7], 5120  }
  0x37   :  { %2177 = vsyncadd [#allocation7], 4294962176  ;;  %v2187_v0 = vmov 0   ;;  %v1895_v1 = vld [vmem:[#allocation3 + $0x4] ss:$16 sps:$4 sm:$0xff]   ;;  %vm2190_vm0 = vmmov 0  }
  0x38   :  { %313 = vmatprep.mubr.bf16.mxu0 %v2187_v0  ;;  %354 = vmatprep.mubr.bf16.mxu1 %v2187_v0  ;;  %v1897_v2 = vld [vmem:[#allocation3 + $0xc] ss:$16 sps:$4 sm:$0xff]   ;;  %v1899_v3 = vld [vmem:[#allocation3] ss:$16 sps:$4 sm:$0xff]   ;;  %v1900_v4 = vld [vmem:[#allocation3 + $0x8] ss:$16 sps:$4 sm:$0xff]  }
  0x39   :  { %281 = vmatprep.subr.bf16.mxu0 %v1895_v1  ;;  %322 = vmatprep.subr.bf16.mxu1 %v1897_v2  ;;  %v1901_v5 = vld [vmem:[#allocation3 + $0x24] ss:$16 sps:$4 sm:$0xff]   ;;  %v1903_v6 = vld [vmem:[#allocation3 + $0x2c] ss:$16 sps:$4 sm:$0xff]   ;;  %v1905_v7 = vld [vmem:[#allocation3 + $0x20] ss:$16 sps:$4 sm:$0xff]  }
  0x3a   :  { %282 = vmatpush1.bf16.msra.mxu0 %v1899_v3  ;;  %323 = vmatpush1.bf16.msra.mxu1 %v1900_v4  ;;  %v1906_v8 = vld [vmem:[#allocation3 + $0x28] ss:$16 sps:$4 sm:$0xff]   ;;  %v1907_v9 = vld [vmem:[#allocation3 + $0x44] ss:$16 sps:$4 sm:$0xff]   ;;  %v1909_v10 = vld [vmem:[#allocation3 + $0x4c] ss:$16 sps:$4 sm:$0xff]   ;;  %v101_v3 = vlaneseq }
  0x3b   :  { %283 = vmatprep.subr.bf16.mxu0 %v1901_v5  ;;  %324 = vmatprep.subr.bf16.mxu1 %v1903_v6  ;;  %v1911_v11 = vld [vmem:[#allocation3 + $0x40] ss:$16 sps:$4 sm:$0xff]   ;;  %v1912_v12 = vld [vmem:[#allocation3 + $0x48] ss:$16 sps:$4 sm:$0xff]   ;;  %v1913_v13 = vld [vmem:[#allocation3 + $0x64] ss:$16 sps:$4 sm:$0xff]  }
  0x3c   :  { %v1915_v14 = vld [vmem:[#allocation3 + $0x6c] ss:$16 sps:$4 sm:$0xff]   ;;  %v1917_v15 = vld [vmem:[#allocation3 + $0x60] ss:$16 sps:$4 sm:$0xff]   ;;  %v1918_v16 = vld [vmem:[#allocation3 + $0x68] ss:$16 sps:$4 sm:$0xff]  }
  0x3d   :  { %v1919_v17 = vld [vmem:[#allocation3 + $0x84] ss:$16 sps:$4 sm:$0xff]   ;;  %v1921_v18 = vld [vmem:[#allocation3 + $0x8c] ss:$16 sps:$4 sm:$0xff]   ;;  %v1923_v19 = vld [vmem:[#allocation3 + $0x80] ss:$16 sps:$4 sm:$0xff]  }
  0x3e   :  { %284 = vmatpush1.bf16.msra.mxu0 %v1905_v7  ;;  %325 = vmatpush1.bf16.msra.mxu1 %v1906_v8  ;;  %v1924_v20 = vld [vmem:[#allocation3 + $0x88] ss:$16 sps:$4 sm:$0xff]   ;;  %v1925_v21 = vld [vmem:[#allocation3 + $0xa4] ss:$16 sps:$4 sm:$0xff]   ;;  %v1927_v22 = vld [vmem:[#allocation3 + $0xac] ss:$16 sps:$4 sm:$0xff]  }
  0x3f   :  { %285 = vmatprep.subr.bf16.mxu0 %v1907_v9  ;;  %326 = vmatprep.subr.bf16.mxu1 %v1909_v10  ;;  %v1929_v23 = vld [vmem:[#allocation3 + $0xa0] ss:$16 sps:$4 sm:$0xff]   ;;  %v1930_v24 = vld [vmem:[#allocation3 + $0xa8] ss:$16 sps:$4 sm:$0xff]   ;;  %v1931_v25 = vld [vmem:[#allocation3 + $0xc4] ss:$16 sps:$4 sm:$0xff]  }
  0x40   :  { %v1933_v26 = vld [vmem:[#allocation3 + $0xcc] ss:$16 sps:$4 sm:$0xff]   ;;  %v1935_v27 = vld [vmem:[#allocation3 + $0xc0] ss:$16 sps:$4 sm:$0xff]   ;;  %v1936_v28 = vld [vmem:[#allocation3 + $0xc8] ss:$16 sps:$4 sm:$0xff]  }
  0x41   :  { %v1937_v29 = vld [vmem:[#allocation3 + $0xe4] ss:$16 sps:$4 sm:$0xff]   ;;  %v1939_v30 = vld [vmem:[#allocation3 + $0xec] ss:$16 sps:$4 sm:$0xff]   ;;  %v1941_v31 = vld [vmem:[#allocation3 + $0xe0] ss:$16 sps:$4 sm:$0xff]  }
  0x42   :  { %286 = vmatpush1.bf16.msra.mxu0 %v1911_v11  ;;  %327 = vmatpush1.bf16.msra.mxu1 %v1912_v12  ;;  %v1942_v32 = vld [vmem:[#allocation3 + $0xe8] ss:$16 sps:$4 sm:$0xff]   ;;  %v2272_v33 = vld [vmem:[#allocation6 + $0x4] ss:$16 sps:$4 sm:$0xff]   ;;  %v2274_v34 = vld [vmem:[#allocation6 + $0xc] ss:$16 sps:$4 sm:$0xff]  }
  0x43   :  { %287 = vmatprep.subr.bf16.mxu0 %v1913_v13  ;;  %328 = vmatprep.subr.bf16.mxu1 %v1915_v14  ;;  %v66_v35 = vld [vmem:[%s2662_s0] sm:$0xf]  ;;  %v2281_v37 = vld [vmem:[#allocation6 + $0x8] ss:$16 sps:$4 sm:$0xff]   ;;  %v2283_v38 = vld [vmem:[#allocation6 + $0x24] ss:$16 sps:$4 sm:$0xff]  }
  0x44   :  { %v2279_v36 = vld [vmem:[#allocation6] ss:$16 sps:$4 sm:$0xff]   ;;  %v2287_v39 = vld [vmem:[#allocation6 + $0x2c] ss:$16 sps:$4 sm:$0xff]   ;;  %v2293_v41 = vld [vmem:[#allocation6 + $0x28] ss:$16 sps:$4 sm:$0xff]  }
  0x45   :  { %v2289_v40 = vld [vmem:[#allocation6 + $0x20] ss:$16 sps:$4 sm:$0xff]   ;;  %v2297_v42 = vld [vmem:[#allocation6 + $0x44] ss:$16 sps:$4 sm:$0xff]   ;;  %v2299_v43 = vld [vmem:[#allocation6 + $0x4c] ss:$16 sps:$4 sm:$0xff]  }
  0x46   :  { %288 = vmatpush1.bf16.msra.mxu0 %v1917_v15  ;;  %329 = vmatpush1.bf16.msra.mxu1 %v1918_v16  ;;  %v2303_v44 = vld [vmem:[#allocation6 + $0x40] ss:$16 sps:$4 sm:$0xff]   ;;  %v2305_v45 = vld [vmem:[#allocation6 + $0x48] ss:$16 sps:$4 sm:$0xff]   ;;  %v2309_v46 = vld [vmem:[#allocation6 + $0x64] ss:$16 sps:$4 sm:$0xff]  }
  0x47   :  { %289 = vmatprep.subr.bf16.mxu0 %v1919_v17  ;;  %330 = vmatprep.subr.bf16.mxu1 %v1921_v18  ;;  %v2313_v47 = vld [vmem:[#allocation6 + $0x6c] ss:$16 sps:$4 sm:$0xff]   ;;  %v2315_v48 = vld [vmem:[#allocation6 + $0x60] ss:$16 sps:$4 sm:$0xff]   ;;  %v2317_v49 = vld [vmem:[#allocation6 + $0x68] ss:$16 sps:$4 sm:$0xff]  }
  0x48   :  { %v2319_v50 = vld [vmem:[#allocation6 + $0x84] ss:$16 sps:$4 sm:$0xff]   ;;  %v2321_v51 = vld [vmem:[#allocation6 + $0x8c] ss:$16 sps:$4 sm:$0xff]   ;;  %v2327_v52 = vld [vmem:[#allocation6 + $0x80] ss:$16 sps:$4 sm:$0xff]  }
  0x49   :  { %v2331_v53 = vld [vmem:[#allocation6 + $0x88] ss:$16 sps:$4 sm:$0xff]   ;;  %v2335_v54 = vld [vmem:[#allocation6 + $0xa4] ss:$16 sps:$4 sm:$0xff]   ;;  %v2337_v55 = vld [vmem:[#allocation6 + $0xac] ss:$16 sps:$4 sm:$0xff]  }
  0x4a   :  { %290 = vmatpush1.bf16.msra.mxu0 %v1923_v19  ;;  %331 = vmatpush1.bf16.msra.mxu1 %v1924_v20  ;;  %v2341_v56 = vld [vmem:[#allocation6 + $0xa0] ss:$16 sps:$4 sm:$0xff]   ;;  %v2343_v57 = vld [vmem:[#allocation6 + $0xa8] ss:$16 sps:$4 sm:$0xff]   ;;  %v2347_v58 = vld [vmem:[#allocation6 + $0xc4] ss:$16 sps:$4 sm:$0xff]  }
  0x4b   :  { %291 = vmatprep.subr.bf16.mxu0 %v1925_v21  ;;  %332 = vmatprep.subr.bf16.mxu1 %v1927_v22  ;;  %v2349_v59 = vld [vmem:[#allocation6 + $0xcc] ss:$16 sps:$4 sm:$0xff]   ;;  %v2353_v60 = vld [vmem:[#allocation6 + $0xc0] ss:$16 sps:$4 sm:$0xff]   ;;  %v2355_v61 = vld [vmem:[#allocation6 + $0xc8] ss:$16 sps:$4 sm:$0xff]  }
  0x4c   :  { %v2359_v62 = vld [vmem:[#allocation6 + $0xe4] ss:$16 sps:$4 sm:$0xff]   ;;  %v2361_v63 = vld [vmem:[#allocation6 + $0xec] ss:$16 sps:$4 sm:$0xff]   ;;  %v2365_v1 = vld [vmem:[#allocation6 + $0xe0] ss:$16 sps:$4 sm:$0xff]  }
  0x4d   :  { %v2367_v2 = vld [vmem:[#allocation6 + $0xe8] ss:$16 sps:$4 sm:$0xff]   ;;  %v102_v4 = vshrl.u32 %v101_v3, 7  ;;  %v99_v7 = vld [vmem:[%s2664_s2] sm:$0xf]  ;;  %vm1743_vm1 = vcmask 1040384  }
  0x4e   :  { %292 = vmatpush1.bf16.msra.mxu0 %v1929_v23  ;;  %333 = vmatpush1.bf16.msra.mxu1 %v1930_v24 }
  0x4f   :  { %293 = vmatprep.subr.bf16.mxu0 %v1931_v25  ;;  %334 = vmatprep.subr.bf16.mxu1 %v1933_v26  ;;  %v103_v5 = vsub.s32 0, %v102_v4  ;;  %v111_v6 = vsub.s32 2, %v102_v4  ;;  %v107_v8 = vsub.s32 1, %v102_v4  ;;  %v115_v9 = vsub.s32 3, %v102_v4 }
  0x50   :  { %v2188_v26 = vmov 1966171168  }
  0x51   :  { %v104_v10 = vrot.slane %v99_v7, %v103_v5  ;;  %v112_v11 = vrot.slane %v99_v7, %v111_v6  ;;  %v108_v12 = vrot.slane %v99_v7, %v107_v8  ;;  %v116_v13 = vrot.slane %v99_v7, %v115_v9 }
  0x52   :  { %294 = vmatpush1.bf16.msra.mxu0 %v1935_v27  ;;  %335 = vmatpush1.bf16.msra.mxu1 %v1936_v28  ;;  %v649_v27 = vunpack.c.l.s4 %v2188_v26 }
  0x53   :  { %295 = vmatprep.subr.bf16.mxu0 %v1937_v29  ;;  %336 = vmatprep.subr.bf16.mxu1 %v1939_v30 }
  0x54   :  { %v650_v28 = vunpack.c.0.s8 %v649_v27 }
  0x56   :  { %296 = vmatpush1.bf16.msra.mxu0 %v1941_v31  ;;  %337 = vmatpush1.bf16.msra.mxu1 %v1942_v32  ;;  %v2414_v29 = vsub.s32 %v650_v28, %v102_v4 }
  0x57   :  { %560 = vmatprep.subr.bf16.mxu0 %v2272_v33  ;;  %601 = vmatprep.subr.bf16.mxu1 %v2274_v34 }
  0x59   :  { %314 = vmatmul.mubr.bf16.vlgmr.msra.gmra.mrb[0].mxu0 %v66_v35  ;;  %355 = vmatmul.mubr.bf16.vlgmr.msra.gmra.mrb[0].mxu1 %v66_v35 }
  0x5a   :  { %561 = vmatpush1.bf16.msra.mxu0 %v2279_v36  ;;  %602 = vmatpush1.bf16.msra.mxu1 %v2281_v37 }
  0x5b   :  { %562 = vmatprep.subr.bf16.mxu0 %v2283_v38  ;;  %603 = vmatprep.subr.bf16.mxu1 %v2287_v39 }
  0x5c   :  { %592 = vmatprep.mubr.bf16.mxu0 %v2187_v0  ;;  %633 = vmatprep.mubr.bf16.mxu1 %v2187_v0 }
  0x5e   :  { %563 = vmatpush1.bf16.msra.mxu0 %v2289_v40  ;;  %604 = vmatpush1.bf16.msra.mxu1 %v2293_v41 }
  0x5f   :  { %564 = vmatprep.subr.bf16.mxu0 %v2297_v42  ;;  %605 = vmatprep.subr.bf16.mxu1 %v2299_v43 }
  0x62   :  { %565 = vmatpush1.bf16.msra.mxu0 %v2303_v44  ;;  %606 = vmatpush1.bf16.msra.mxu1 %v2305_v45 }
  0x63   :  { %566 = vmatprep.subr.bf16.mxu0 %v2309_v46  ;;  %607 = vmatprep.subr.bf16.mxu1 %v2313_v47 }
  0x66   :  { %567 = vmatpush1.bf16.msra.mxu0 %v2315_v48  ;;  %608 = vmatpush1.bf16.msra.mxu1 %v2317_v49 }
  0x67   :  { %568 = vmatprep.subr.bf16.mxu0 %v2319_v50  ;;  %609 = vmatprep.subr.bf16.mxu1 %v2321_v51 }
  0x6a   :  { %569 = vmatpush1.bf16.msra.mxu0 %v2327_v52  ;;  %610 = vmatpush1.bf16.msra.mxu1 %v2331_v53 }
  0x6b   :  { %570 = vmatprep.subr.bf16.mxu0 %v2335_v54  ;;  %611 = vmatprep.subr.bf16.mxu1 %v2337_v55 }
  0x6e   :  { %571 = vmatpush1.bf16.msra.mxu0 %v2341_v56  ;;  %612 = vmatpush1.bf16.msra.mxu1 %v2343_v57 }
  0x6f   :  { %572 = vmatprep.subr.bf16.mxu0 %v2347_v58  ;;  %613 = vmatprep.subr.bf16.mxu1 %v2349_v59 }
  0x72   :  { %573 = vmatpush1.bf16.msra.mxu0 %v2353_v60  ;;  %614 = vmatpush1.bf16.msra.mxu1 %v2355_v61 }
  0x73   :  { %574 = vmatprep.subr.bf16.mxu0 %v2359_v62  ;;  %615 = vmatprep.subr.bf16.mxu1 %v2361_v63 }
  0x76   :  { %575 = vmatpush1.bf16.msra.mxu0 %v2365_v1  ;;  %616 = vmatpush1.bf16.msra.mxu1 %v2367_v2 }
  0x77   :  { %695 = vmatprep.subr.bf16.mxu0 %v2272_v33  ;;  %736 = vmatprep.subr.bf16.mxu1 %v2274_v34 }
  0x79   :  { %593 = vmatmul.mubr.bf16.vlgmr.msra.gmra.mrb[4].mxu0 %v2187_v0  ;;  %634 = vmatmul.mubr.bf16.vlgmr.msra.gmra.mrb[4].mxu1 %v2187_v0 }
  0x7a   :  { %696 = vmatpush1.bf16.msra.mxu0 %v2279_v36  ;;  %737 = vmatpush1.bf16.msra.mxu1 %v2281_v37 }
  0x7b   :  { %697 = vmatprep.subr.bf16.mxu0 %v2283_v38  ;;  %738 = vmatprep.subr.bf16.mxu1 %v2287_v39 }
  0x7c   :  { %727 = vmatprep.mubr.bf16.mxu0 %v2187_v0  ;;  %768 = vmatprep.mubr.bf16.mxu1 %v2187_v0 }
  0x7e   :  { %698 = vmatpush1.bf16.msra.mxu0 %v2289_v40  ;;  %739 = vmatpush1.bf16.msra.mxu1 %v2293_v41 }
  0x7f   :  { %699 = vmatprep.subr.bf16.mxu0 %v2297_v42  ;;  %740 = vmatprep.subr.bf16.mxu1 %v2299_v43 }
  0x82   :  { %700 = vmatpush1.bf16.msra.mxu0 %v2303_v44  ;;  %741 = vmatpush1.bf16.msra.mxu1 %v2305_v45 }
  0x83   :  { %701 = vmatprep.subr.bf16.mxu0 %v2309_v46  ;;  %742 = vmatprep.subr.bf16.mxu1 %v2313_v47 }
  0x86   :  { %702 = vmatpush1.bf16.msra.mxu0 %v2315_v48  ;;  %743 = vmatpush1.bf16.msra.mxu1 %v2317_v49 }
  0x87   :  { %703 = vmatprep.subr.bf16.mxu0 %v2319_v50  ;;  %744 = vmatprep.subr.bf16.mxu1 %v2321_v51 }
  0x8a   :  { %704 = vmatpush1.bf16.msra.mxu0 %v2327_v52  ;;  %745 = vmatpush1.bf16.msra.mxu1 %v2331_v53 }
  0x8b   :  { %705 = vmatprep.subr.bf16.mxu0 %v2335_v54  ;;  %746 = vmatprep.subr.bf16.mxu1 %v2337_v55 }
  0x8e   :  { %706 = vmatpush1.bf16.msra.mxu0 %v2341_v56  ;;  %747 = vmatpush1.bf16.msra.mxu1 %v2343_v57 }
  0x8f   :  { %707 = vmatprep.subr.bf16.mxu0 %v2347_v58  ;;  %748 = vmatprep.subr.bf16.mxu1 %v2349_v59 }
  0x92   :  { %708 = vmatpush1.bf16.msra.mxu0 %v2353_v60  ;;  %749 = vmatpush1.bf16.msra.mxu1 %v2355_v61 }
  0x93   :  { %709 = vmatprep.subr.bf16.mxu0 %v2359_v62  ;;  %750 = vmatprep.subr.bf16.mxu1 %v2361_v63 }
  0x96   :  { %710 = vmatpush1.bf16.msra.mxu0 %v2365_v1  ;;  %751 = vmatpush1.bf16.msra.mxu1 %v2367_v2 }
  0x97   :  { %830 = vmatprep.subr.bf16.mxu0 %v2272_v33  ;;  %871 = vmatprep.subr.bf16.mxu1 %v2274_v34 }
 0x12c   :  { %v315_v14 = vpop.f32.mrb[0].mxu0  ;;  %v356_v15 = vpop.f32.mrb[0].mxu1 }
 0x12d   :  { %v316_v16 = vadd.f32 %v315_v14, %v104_v10  ;;  %v357_v17 = vadd.f32 %v356_v15, %v112_v11  ;;  %v317_v18 = vpop.f32.mrb[1].mxu0  ;;  %v358_v19 = vpop.f32.mrb[1].mxu1 }
 0x12e   :  { %v318_v20 = vadd.f32 %v317_v18, %v108_v12  ;;  %v359_v21 = vadd.f32 %v358_v19, %v116_v13  ;;  %v319_v22 = vpop.f32.mrb[2].mxu0  ;;  %v360_v23 = vpop.f32.mrb[2].mxu1 }
 0x12f   :  { %363 = vst [vmem:[#allocation2] sm:$0xff] %v316_v16  ;;  %365 = vst [vmem:[#allocation2 + $0x10] sm:$0xff] %v357_v17  ;;  %v320_v24 = vpop.f32.mrb[3].mxu0  ;;  %v361_v25 = vpop.f32.mrb[3].mxu1 }
 0x130   :  { %364 = vst [vmem:[#allocation2 + $0x8] sm:$0xff] %v318_v20  ;;  %366 = vst [vmem:[#allocation2 + $0x18] sm:$0xff] %v359_v21 }
 0x137   :  { %v367_v14 = vld [vmem:[#allocation2] ss:$8 sm:$0xf] }
 0x14c   :  { %v594_v30 = vpop.f32.mrb[4].mxu0  ;;  %v635_v31 = vpop.f32.mrb[4].mxu1 }
 0x14d   :  { %v596_v32 = vpop.f32.mrb[5].mxu0  ;;  %v637_v35 = vpop.f32.mrb[5].mxu1 }
 0x14e   :  { %v646_v3 = vcombine.low %v594_v30, %v596_v32  ;;  %v647_v5 = vcombine.low %v635_v31, %v637_v35  ;;  %v598_v6 = vpop.f32.mrb[6].mxu0  ;;  %v639_v7 = vpop.f32.mrb[6].mxu1 }
 0x14f   :  { %v599_v8 = vpop.f32.mrb[7].mxu0  ;;  %v640_v9 = vpop.f32.mrb[7].mxu1 }
 0x150   :  { %v654_v10 = vrot.slane %v646_v3, %v2414_v29  ;;  %v661_v11 = vrot.slane %v647_v5, %v2414_v29 }
 0x152   :  { %v662_v12 = vcombine.low %v654_v10, %v661_v11 }
 0x154   :  { %v669_v13 = vrot.slane %v662_v12, %v2414_v29 }
 0x156   :  { %v671_v4 = vadd.f32 %v669_v13, %v367_v14  ;;  %v693_v14 = vld [vmem:[#allocation2 + $0x1] ss:$8 sm:$0xf] }
 0x158   :  { %v1838_v15 = vmul.f32 -1.442695, %v671_v4  ;;  %v679_v18 = vrot.slane %v671_v4, 3 }
 0x15a   :  { %1999 = vpow2.f32 %v1838_v15 }
 0x164   :  { %v2000_v16 = vpop.eup %1999 }
 0x165   :  { %v675_v17 = vadd.f32 1.0, %v2000_v16 }
 0x167   :  { %2001 = vrcp.f32 %v675_v17 }
 0x168   :  { %2003 = vtanh.f32 %v679_v18 }
 0x171   :  { %v2002_v19 = vpop.eup %2001 }
 0x172   :  { %v683_v20 = vrot.slane %v2002_v19, 1  ;;  %v2004_v21 = vpop.eup %2003  ;;  %v689_v25 = vrot.slane %v2002_v19, 2 }
 0x173   :  { %v686_v22 = vmul.f32 %v2004_v21, %v2002_v19 }
 0x174   :  { %v685_v23 = vmul.f32 0.0, %v683_v20 }
 0x176   :  { %v2419_v24 = vadd.f32 %v686_v22, %v685_v23 }
 0x178   :  { %2005 = vtanh.f32 %v2419_v24 }
 0x182   :  { %v2006_v26 = vpop.eup %2005 }
 0x183   :  { %v691_v27 = vmul.f32 %v2006_v26, %v689_v25 }
 0x185   :  { %v694_v28 = vpack.c.bf16 %v691_v27, %v691_v27 }
 0x187   :  { %728 = vmatmul.mubr.bf16.vlgmr.msra.gmra.mrb[8].mxu0 %v694_v28  ;;  %769 = vmatmul.mubr.bf16.vlgmr.msra.gmra.mrb[8].mxu1 %v694_v28 }
 0x188   :  { %831 = vmatpush1.bf16.msra.mxu0 %v2279_v36  ;;  %872 = vmatpush1.bf16.msra.mxu1 %v2281_v37 }
 0x189   :  { %832 = vmatprep.subr.bf16.mxu0 %v2283_v38  ;;  %873 = vmatprep.subr.bf16.mxu1 %v2287_v39 }
 0x18a   :  { %862 = vmatprep.mubr.bf16.mxu0 %v2187_v0  ;;  %903 = vmatprep.mubr.bf16.mxu1 %v2187_v0 }
 0x18c   :  { %833 = vmatpush1.bf16.msra.mxu0 %v2289_v40  ;;  %874 = vmatpush1.bf16.msra.mxu1 %v2293_v41 }
 0x18d   :  { %834 = vmatprep.subr.bf16.mxu0 %v2297_v42  ;;  %875 = vmatprep.subr.bf16.mxu1 %v2299_v43 }
 0x190   :  { %835 = vmatpush1.bf16.msra.mxu0 %v2303_v44  ;;  %876 = vmatpush1.bf16.msra.mxu1 %v2305_v45 }
 0x191   :  { %836 = vmatprep.subr.bf16.mxu0 %v2309_v46  ;;  %877 = vmatprep.subr.bf16.mxu1 %v2313_v47 }
 0x194   :  { %837 = vmatpush1.bf16.msra.mxu0 %v2315_v48  ;;  %878 = vmatpush1.bf16.msra.mxu1 %v2317_v49 }
 0x195   :  { %838 = vmatprep.subr.bf16.mxu0 %v2319_v50  ;;  %879 = vmatprep.subr.bf16.mxu1 %v2321_v51 }
 0x198   :  { %839 = vmatpush1.bf16.msra.mxu0 %v2327_v52  ;;  %880 = vmatpush1.bf16.msra.mxu1 %v2331_v53 }
 0x199   :  { %840 = vmatprep.subr.bf16.mxu0 %v2335_v54  ;;  %881 = vmatprep.subr.bf16.mxu1 %v2337_v55 }
 0x19c   :  { %841 = vmatpush1.bf16.msra.mxu0 %v2341_v56  ;;  %882 = vmatpush1.bf16.msra.mxu1 %v2343_v57 }
 0x19d   :  { %842 = vmatprep.subr.bf16.mxu0 %v2347_v58  ;;  %883 = vmatprep.subr.bf16.mxu1 %v2349_v59 }
 0x1a0   :  { %843 = vmatpush1.bf16.msra.mxu0 %v2353_v60  ;;  %884 = vmatpush1.bf16.msra.mxu1 %v2355_v61 }
 0x1a1   :  { %844 = vmatprep.subr.bf16.mxu0 %v2359_v62  ;;  %885 = vmatprep.subr.bf16.mxu1 %v2361_v63 }
 0x1a4   :  { %845 = vmatpush1.bf16.msra.mxu0 %v2365_v1  ;;  %886 = vmatpush1.bf16.msra.mxu1 %v2367_v2 }
 0x1a5   :  { %965 = vmatprep.subr.bf16.mxu0 %v2272_v33  ;;  %1006 = vmatprep.subr.bf16.mxu1 %v2274_v34 }
 0x25a   :  { %v729_v30 = vpop.f32.mrb[8].mxu0  ;;  %v770_v31 = vpop.f32.mrb[8].mxu1 }
 0x25b   :  { %v731_v32 = vpop.f32.mrb[9].mxu0  ;;  %v772_v35 = vpop.f32.mrb[9].mxu1 }
 0x25c   :  { %v781_v3 = vcombine.low %v729_v30, %v731_v32  ;;  %v782_v5 = vcombine.low %v770_v31, %v772_v35  ;;  %v733_v6 = vpop.f32.mrb[10].mxu0  ;;  %v774_v7 = vpop.f32.mrb[10].mxu1 }
 0x25d   :  { %v734_v8 = vpop.f32.mrb[11].mxu0  ;;  %v775_v9 = vpop.f32.mrb[11].mxu1 }
 0x25e   :  { %v789_v10 = vrot.slane %v781_v3, %v2414_v29  ;;  %v796_v11 = vrot.slane %v782_v5, %v2414_v29 }
 0x260   :  { %v797_v12 = vcombine.low %v789_v10, %v796_v11 }
 0x262   :  { %v804_v13 = vrot.slane %v797_v12, %v2414_v29 }
 0x264   :  { %v806_v4 = vadd.f32 %v804_v13, %v693_v14  ;;  %v828_v14 = vld [vmem:[#allocation2 + $0x2] ss:$8 sm:$0xf] }
 0x266   :  { %v1839_v15 = vmul.f32 -1.442695, %v806_v4  ;;  %v814_v18 = vrot.slane %v806_v4, 3 }
 0x268   :  { %2007 = vpow2.f32 %v1839_v15 }
 0x272   :  { %v2008_v16 = vpop.eup %2007 }
 0x273   :  { %v810_v17 = vadd.f32 1.0, %v2008_v16 }
 0x275   :  { %2009 = vrcp.f32 %v810_v17 }
 0x276   :  { %2011 = vtanh.f32 %v814_v18 }
 0x27f   :  { %v2010_v19 = vpop.eup %2009 }
 0x280   :  { %v818_v20 = vrot.slane %v2010_v19, 1  ;;  %v2012_v21 = vpop.eup %2011  ;;  %v824_v26 = vrot.slane %v2010_v19, 2 }
 0x281   :  { %v821_v22 = vmul.f32 %v2012_v21, %v2010_v19 }
 0x282   :  { %v820_v23 = vmul.f32 %v818_v20, %v2419_v24 }
 0x284   :  { %v2460_v25 = vadd.f32 %v821_v22, %v820_v23 }
 0x286   :  { %2013 = vtanh.f32 %v2460_v25 }
 0x290   :  { %v2014_v27 = vpop.eup %2013 }
 0x291   :  { %v826_v28 = vmul.f32 %v2014_v27, %v824_v26 }
 0x293   :  { %v829_v30 = vpack.c.bf16 %v826_v28, %v826_v28 }
 0x295   :  { %863 = vmatmul.mubr.bf16.vlgmr.msra.gmra.mrb[12].mxu0 %v829_v30  ;;  %904 = vmatmul.mubr.bf16.vlgmr.msra.gmra.mrb[12].mxu1 %v829_v30 }
 0x296   :  { %966 = vmatpush1.bf16.msra.mxu0 %v2279_v36  ;;  %1007 = vmatpush1.bf16.msra.mxu1 %v2281_v37 }
 0x297   :  { %967 = vmatprep.subr.bf16.mxu0 %v2283_v38  ;;  %1008 = vmatprep.subr.bf16.mxu1 %v2287_v39 }
 0x298   :  { %997 = vmatprep.mubr.bf16.mxu0 %v2187_v0  ;;  %1038 = vmatprep.mubr.bf16.mxu1 %v2187_v0 }
 0x29a   :  { %968 = vmatpush1.bf16.msra.mxu0 %v2289_v40  ;;  %1009 = vmatpush1.bf16.msra.mxu1 %v2293_v41 }
 0x29b   :  { %969 = vmatprep.subr.bf16.mxu0 %v2297_v42  ;;  %1010 = vmatprep.subr.bf16.mxu1 %v2299_v43 }
 0x29e   :  { %970 = vmatpush1.bf16.msra.mxu0 %v2303_v44  ;;  %1011 = vmatpush1.bf16.msra.mxu1 %v2305_v45 }
 0x29f   :  { %971 = vmatprep.subr.bf16.mxu0 %v2309_v46  ;;  %1012 = vmatprep.subr.bf16.mxu1 %v2313_v47 }
 0x2a2   :  { %972 = vmatpush1.bf16.msra.mxu0 %v2315_v48  ;;  %1013 = vmatpush1.bf16.msra.mxu1 %v2317_v49 }
 0x2a3   :  { %973 = vmatprep.subr.bf16.mxu0 %v2319_v50  ;;  %1014 = vmatprep.subr.bf16.mxu1 %v2321_v51 }
 0x2a6   :  { %974 = vmatpush1.bf16.msra.mxu0 %v2327_v52  ;;  %1015 = vmatpush1.bf16.msra.mxu1 %v2331_v53 }
 0x2a7   :  { %975 = vmatprep.subr.bf16.mxu0 %v2335_v54  ;;  %1016 = vmatprep.subr.bf16.mxu1 %v2337_v55 }
 0x2aa   :  { %976 = vmatpush1.bf16.msra.mxu0 %v2341_v56  ;;  %1017 = vmatpush1.bf16.msra.mxu1 %v2343_v57 }
 0x2ab   :  { %977 = vmatprep.subr.bf16.mxu0 %v2347_v58  ;;  %1018 = vmatprep.subr.bf16.mxu1 %v2349_v59 }
 0x2ae   :  { %978 = vmatpush1.bf16.msra.mxu0 %v2353_v60  ;;  %1019 = vmatpush1.bf16.msra.mxu1 %v2355_v61 }
 0x2af   :  { %979 = vmatprep.subr.bf16.mxu0 %v2359_v62  ;;  %1020 = vmatprep.subr.bf16.mxu1 %v2361_v63 }
 0x2b2   :  { %980 = vmatpush1.bf16.msra.mxu0 %v2365_v1  ;;  %1021 = vmatpush1.bf16.msra.mxu1 %v2367_v2 }
 0x2b3   :  { %1100 = vmatprep.subr.bf16.mxu0 %v2272_v33  ;;  %1141 = vmatprep.subr.bf16.mxu1 %v2274_v34 }
 0x368   :  { %v864_v24 = vpop.f32.mrb[12].mxu0  ;;  %v905_v31 = vpop.f32.mrb[12].mxu1 }
 0x369   :  { %v866_v32 = vpop.f32.mrb[13].mxu0  ;;  %v907_v35 = vpop.f32.mrb[13].mxu1 }
 0x36a   :  { %v916_v3 = vcombine.low %v864_v24, %v866_v32  ;;  %v917_v5 = vcombine.low %v905_v31, %v907_v35  ;;  %v868_v6 = vpop.f32.mrb[14].mxu0  ;;  %v909_v7 = vpop.f32.mrb[14].mxu1 }
 0x36b   :  { %v869_v8 = vpop.f32.mrb[15].mxu0  ;;  %v910_v9 = vpop.f32.mrb[15].mxu1 }
 0x36c   :  { %v924_v10 = vrot.slane %v916_v3, %v2414_v29  ;;  %v931_v11 = vrot.slane %v917_v5, %v2414_v29 }
 0x36e   :  { %v932_v12 = vcombine.low %v924_v10, %v931_v11 }
 0x370   :  { %v939_v13 = vrot.slane %v932_v12, %v2414_v29 }
 0x372   :  { %v941_v4 = vadd.f32 %v939_v13, %v828_v14  ;;  %v963_v14 = vld [vmem:[#allocation2 + $0x3] ss:$8 sm:$0xf] }
 0x374   :  { %v1840_v15 = vmul.f32 -1.442695, %v941_v4  ;;  %v949_v18 = vrot.slane %v941_v4, 3 }
 0x376   :  { %2015 = vpow2.f32 %v1840_v15 }
 0x380   :  { %v2016_v16 = vpop.eup %2015 }
 0x381   :  { %v945_v17 = vadd.f32 1.0, %v2016_v16 }
 0x383   :  { %2017 = vrcp.f32 %v945_v17 }
 0x384   :  { %2019 = vtanh.f32 %v949_v18 }
 0x38d   :  { %v2018_v19 = vpop.eup %2017 }
 0x38e   :  { %v953_v20 = vrot.slane %v2018_v19, 1  ;;  %v2020_v21 = vpop.eup %2019  ;;  %v959_v27 = vrot.slane %v2018_v19, 2 }
 0x38f   :  { %v956_v22 = vmul.f32 %v2020_v21, %v2018_v19 }
 0x390   :  { %v955_v23 = vmul.f32 %v953_v20, %v2460_v25 }
 0x392   :  { %v2501_v26 = vadd.f32 %v956_v22, %v955_v23 }
 0x394   :  { %2021 = vtanh.f32 %v2501_v26 }
 0x39e   :  { %v2022_v28 = vpop.eup %2021 }
 0x39f   :  { %v961_v30 = vmul.f32 %v2022_v28, %v959_v27 }
 0x3a1   :  { %v964_v24 = vpack.c.bf16 %v961_v30, %v961_v30 }
 0x3a3   :  { %998 = vmatmul.mubr.bf16.vlgmr.msra.gmra.mrb[16].mxu0 %v964_v24  ;;  %1039 = vmatmul.mubr.bf16.vlgmr.msra.gmra.mrb[16].mxu1 %v964_v24 }
 0x3a4   :  { %1101 = vmatpush1.bf16.msra.mxu0 %v2279_v36  ;;  %1142 = vmatpush1.bf16.msra.mxu1 %v2281_v37 }
 0x3a5   :  { %1102 = vmatprep.subr.bf16.mxu0 %v2283_v38  ;;  %1143 = vmatprep.subr.bf16.mxu1 %v2287_v39 }
 0x3a6   :  { %1132 = vmatprep.mubr.bf16.mxu0 %v2187_v0  ;;  %1173 = vmatprep.mubr.bf16.mxu1 %v2187_v0 }
 0x3a8   :  { %1103 = vmatpush1.bf16.msra.mxu0 %v2289_v40  ;;  %1144 = vmatpush1.bf16.msra.mxu1 %v2293_v41 }
 0x3a9   :  { %1104 = vmatprep.subr.bf16.mxu0 %v2297_v42  ;;  %1145 = vmatprep.subr.bf16.mxu1 %v2299_v43 }
 0x3ac   :  { %1105 = vmatpush1.bf16.msra.mxu0 %v2303_v44  ;;  %1146 = vmatpush1.bf16.msra.mxu1 %v2305_v45 }
 0x3ad   :  { %1106 = vmatprep.subr.bf16.mxu0 %v2309_v46  ;;  %1147 = vmatprep.subr.bf16.mxu1 %v2313_v47 }
 0x3b0   :  { %1107 = vmatpush1.bf16.msra.mxu0 %v2315_v48  ;;  %1148 = vmatpush1.bf16.msra.mxu1 %v2317_v49 }
 0x3b1   :  { %1108 = vmatprep.subr.bf16.mxu0 %v2319_v50  ;;  %1149 = vmatprep.subr.bf16.mxu1 %v2321_v51 }
 0x3b4   :  { %1109 = vmatpush1.bf16.msra.mxu0 %v2327_v52  ;;  %1150 = vmatpush1.bf16.msra.mxu1 %v2331_v53 }
 0x3b5   :  { %1110 = vmatprep.subr.bf16.mxu0 %v2335_v54  ;;  %1151 = vmatprep.subr.bf16.mxu1 %v2337_v55 }
 0x3b8   :  { %1111 = vmatpush1.bf16.msra.mxu0 %v2341_v56  ;;  %1152 = vmatpush1.bf16.msra.mxu1 %v2343_v57 }
 0x3b9   :  { %1112 = vmatprep.subr.bf16.mxu0 %v2347_v58  ;;  %1153 = vmatprep.subr.bf16.mxu1 %v2349_v59 }
 0x3bc   :  { %1113 = vmatpush1.bf16.msra.mxu0 %v2353_v60  ;;  %1154 = vmatpush1.bf16.msra.mxu1 %v2355_v61 }
 0x3bd   :  { %1114 = vmatprep.subr.bf16.mxu0 %v2359_v62  ;;  %1155 = vmatprep.subr.bf16.mxu1 %v2361_v63 }
 0x3c0   :  { %1115 = vmatpush1.bf16.msra.mxu0 %v2365_v1  ;;  %1156 = vmatpush1.bf16.msra.mxu1 %v2367_v2 }
 0x3c1   :  { %1235 = vmatprep.subr.bf16.mxu0 %v2272_v33  ;;  %1276 = vmatprep.subr.bf16.mxu1 %v2274_v34 }
 0x476   :  { %v999_v25 = vpop.f32.mrb[16].mxu0  ;;  %v1040_v31 = vpop.f32.mrb[16].mxu1 }
 0x477   :  { %v1001_v32 = vpop.f32.mrb[17].mxu0  ;;  %v1042_v35 = vpop.f32.mrb[17].mxu1 }
 0x478   :  { %v1051_v3 = vcombine.low %v999_v25, %v1001_v32  ;;  %v1052_v5 = vcombine.low %v1040_v31, %v1042_v35  ;;  %v1003_v6 = vpop.f32.mrb[18].mxu0  ;;  %v1044_v7 = vpop.f32.mrb[18].mxu1 }
 0x479   :  { %v1004_v8 = vpop.f32.mrb[19].mxu0  ;;  %v1045_v9 = vpop.f32.mrb[19].mxu1 }
 0x47a   :  { %v1059_v10 = vrot.slane %v1051_v3, %v2414_v29  ;;  %v1066_v11 = vrot.slane %v1052_v5, %v2414_v29 }
 0x47c   :  { %v1067_v12 = vcombine.low %v1059_v10, %v1066_v11 }
 0x47e   :  { %v1074_v13 = vrot.slane %v1067_v12, %v2414_v29 }
 0x480   :  { %v1076_v4 = vadd.f32 %v1074_v13, %v963_v14 }
 0x482   :  { %v1841_v15 = vmul.f32 -1.442695, %v1076_v4  ;;  %v1084_v18 = vrot.slane %v1076_v4, 3 }
 0x484   :  { %2023 = vpow2.f32 %v1841_v15 }
 0x48e   :  { %v2024_v16 = vpop.eup %2023 }
 0x48f   :  { %v1080_v17 = vadd.f32 1.0, %v2024_v16 }
 0x491   :  { %2025 = vrcp.f32 %v1080_v17 }
 0x492   :  { %2027 = vtanh.f32 %v1084_v18 }
 0x49b   :  { %v2026_v19 = vpop.eup %2025 }
 0x49c   :  { %v1088_v20 = vrot.slane %v2026_v19, 1  ;;  %v2028_v21 = vpop.eup %2027  ;;  %v1094_v28 = vrot.slane %v2026_v19, 2 }
 0x49d   :  { %v1091_v22 = vmul.f32 %v2028_v21, %v2026_v19 }
 0x49e   :  { %v1090_v23 = vmul.f32 %v1088_v20, %v2501_v26 }
 0x4a0   :  { %v2542_v27 = vadd.f32 %v1091_v22, %v1090_v23 }
 0x4a2   :  { %2029 = vtanh.f32 %v2542_v27 }
 0x4ac   :  { %v2030_v30 = vpop.eup %2029 }
 0x4ad   :  { %v1096_v24 = vmul.f32 %v2030_v30, %v1094_v28 }
 0x4af   :  { %v1099_v25 = vpack.c.bf16 %v1096_v24, %v1096_v24 }
 0x4b1   :  { %1133 = vmatmul.mubr.bf16.vlgmr.msra.gmra.mrb[20].mxu0 %v1099_v25  ;;  %1174 = vmatmul.mubr.bf16.vlgmr.msra.gmra.mrb[20].mxu1 %v1099_v25 }
 0x4b2   :  { %1236 = vmatpush1.bf16.msra.mxu0 %v2279_v36  ;;  %1277 = vmatpush1.bf16.msra.mxu1 %v2281_v37 }
 0x4b3   :  { %1237 = vmatprep.subr.bf16.mxu0 %v2283_v38  ;;  %1278 = vmatprep.subr.bf16.mxu1 %v2287_v39 }
 0x4b4   :  { %1267 = vmatprep.mubr.bf16.mxu0 %v2187_v0  ;;  %1308 = vmatprep.mubr.bf16.mxu1 %v2187_v0 }
 0x4b6   :  { %1238 = vmatpush1.bf16.msra.mxu0 %v2289_v40  ;;  %1279 = vmatpush1.bf16.msra.mxu1 %v2293_v41 }
 0x4b7   :  { %1239 = vmatprep.subr.bf16.mxu0 %v2297_v42  ;;  %1280 = vmatprep.subr.bf16.mxu1 %v2299_v43 }
 0x4ba   :  { %1240 = vmatpush1.bf16.msra.mxu0 %v2303_v44  ;;  %1281 = vmatpush1.bf16.msra.mxu1 %v2305_v45 }
 0x4bb   :  { %1241 = vmatprep.subr.bf16.mxu0 %v2309_v46  ;;  %1282 = vmatprep.subr.bf16.mxu1 %v2313_v47 }
 0x4be   :  { %1242 = vmatpush1.bf16.msra.mxu0 %v2315_v48  ;;  %1283 = vmatpush1.bf16.msra.mxu1 %v2317_v49 }
 0x4bf   :  { %1243 = vmatprep.subr.bf16.mxu0 %v2319_v50  ;;  %1284 = vmatprep.subr.bf16.mxu1 %v2321_v51 }
 0x4c2   :  { %1244 = vmatpush1.bf16.msra.mxu0 %v2327_v52  ;;  %1285 = vmatpush1.bf16.msra.mxu1 %v2331_v53 }
 0x4c3   :  { %1245 = vmatprep.subr.bf16.mxu0 %v2335_v54  ;;  %1286 = vmatprep.subr.bf16.mxu1 %v2337_v55 }
 0x4c6   :  { %1246 = vmatpush1.bf16.msra.mxu0 %v2341_v56  ;;  %1287 = vmatpush1.bf16.msra.mxu1 %v2343_v57 }
 0x4c7   :  { %1247 = vmatprep.subr.bf16.mxu0 %v2347_v58  ;;  %1288 = vmatprep.subr.bf16.mxu1 %v2349_v59 }
 0x4ca   :  { %1248 = vmatpush1.bf16.msra.mxu0 %v2353_v60  ;;  %1289 = vmatpush1.bf16.msra.mxu1 %v2355_v61 }
 0x4cb   :  { %1249 = vmatprep.subr.bf16.mxu0 %v2359_v62  ;;  %1290 = vmatprep.subr.bf16.mxu1 %v2361_v63 }
 0x4ce   :  { %1250 = vmatpush1.bf16.msra.mxu0 %v2365_v1  ;;  %1291 = vmatpush1.bf16.msra.mxu1 %v2367_v2 }
 0x4cf   :  { %1370 = vmatprep.subr.bf16.mxu0 %v2272_v33  ;;  %1411 = vmatprep.subr.bf16.mxu1 %v2274_v34  ;;  %v1098_v33 = vld [vmem:[#allocation2 + $0x4] ss:$8 sm:$0xf] }
 0x584   :  { %v1134_v26 = vpop.f32.mrb[20].mxu0  ;;  %v1175_v31 = vpop.f32.mrb[20].mxu1 }
 0x585   :  { %v1136_v32 = vpop.f32.mrb[21].mxu0  ;;  %v1177_v35 = vpop.f32.mrb[21].mxu1 }
 0x586   :  { %v1186_v3 = vcombine.low %v1134_v26, %v1136_v32  ;;  %v1187_v5 = vcombine.low %v1175_v31, %v1177_v35  ;;  %v1138_v6 = vpop.f32.mrb[22].mxu0  ;;  %v1179_v7 = vpop.f32.mrb[22].mxu1 }
 0x587   :  { %v1139_v8 = vpop.f32.mrb[23].mxu0  ;;  %v1180_v9 = vpop.f32.mrb[23].mxu1 }
 0x588   :  { %v1194_v10 = vrot.slane %v1186_v3, %v2414_v29  ;;  %v1201_v11 = vrot.slane %v1187_v5, %v2414_v29 }
 0x58a   :  { %v1202_v12 = vcombine.low %v1194_v10, %v1201_v11 }
 0x58c   :  { %v1209_v13 = vrot.slane %v1202_v12, %v2414_v29 }
 0x58e   :  { %v1211_v14 = vadd.f32 %v1209_v13, %v1098_v33  ;;  %v2069_v13 = vld [vmem:[#allocation6] ss:$16 sps:$4 sm:$0xff]   ;;  %v2070_v33 = vld [vmem:[#allocation6 + $0x8] ss:$16 sps:$4 sm:$0xff]  }
 0x590   :  { %v1842_v34 = vmul.f32 -1.442695, %v1211_v14  ;;  %v1219_v16 = vrot.slane %v1211_v14, 3  ;;  %v2071_v14 = vld [vmem:[#allocation6 + $0x24] ss:$16 sps:$4 sm:$0xff]  }
 0x592   :  { %2031 = vpow2.f32 %v1842_v34  ;;  %v2072_v34 = vld [vmem:[#allocation6 + $0x2c] ss:$16 sps:$4 sm:$0xff]  }
 0x59c   :  { %v2032_v4 = vpop.eup %2031 }
 0x59d   :  { %v1215_v15 = vadd.f32 1.0, %v2032_v4  ;;  %v2073_v4 = vld [vmem:[#allocation6 + $0x20] ss:$16 sps:$4 sm:$0xff]  }
 0x59f   :  { %2033 = vrcp.f32 %v1215_v15  ;;  %v2074_v15 = vld [vmem:[#allocation6 + $0x28] ss:$16 sps:$4 sm:$0xff]  }
 0x5a0   :  { %2035 = vtanh.f32 %v1219_v16  ;;  %v2075_v16 = vld [vmem:[#allocation6 + $0x44] ss:$16 sps:$4 sm:$0xff]  }
 0x5a9   :  { %v2034_v17 = vpop.eup %2033 }
 0x5aa   :  { %v1223_v18 = vrot.slane %v2034_v17, 1  ;;  %v2036_v19 = vpop.eup %2035  ;;  %v1229_v23 = vrot.slane %v2034_v17, 2 }
 0x5ab   :  { %v1226_v20 = vmul.f32 %v2036_v19, %v2034_v17  ;;  %v2076_v17 = vld [vmem:[#allocation6 + $0x4c] ss:$16 sps:$4 sm:$0xff]   ;;  %v2078_v19 = vld [vmem:[#allocation6 + $0x48] ss:$16 sps:$4 sm:$0xff]  }
 0x5ac   :  { %v1225_v21 = vmul.f32 %v1223_v18, %v2542_v27  ;;  %v2077_v18 = vld [vmem:[#allocation6 + $0x40] ss:$16 sps:$4 sm:$0xff]  }
 0x5ae   :  { %v2583_v22 = vadd.f32 %v1226_v20, %v1225_v21  ;;  %v2079_v20 = vld [vmem:[#allocation6 + $0x64] ss:$16 sps:$4 sm:$0xff]   ;;  %v2080_v21 = vld [vmem:[#allocation6 + $0x6c] ss:$16 sps:$4 sm:$0xff]  }
 0x5b0   :  { %2037 = vtanh.f32 %v2583_v22 }
 0x5ba   :  { %v2038_v28 = vpop.eup %2037 }
 0x5bb   :  { %v1231_v30 = vmul.f32 %v2038_v28, %v1229_v23  ;;  %v2082_v23 = vld [vmem:[#allocation6 + $0x68] ss:$16 sps:$4 sm:$0xff]   ;;  %v2084_v28 = vld [vmem:[#allocation6 + $0x8c] ss:$16 sps:$4 sm:$0xff]  }
 0x5bd   :  { %v1234_v24 = vpack.c.bf16 %v1231_v30, %v1231_v30  ;;  %v2085_v30 = vld [vmem:[#allocation6 + $0x80] ss:$16 sps:$4 sm:$0xff]  }
 0x5bf   :  { %1268 = vmatmul.mubr.bf16.vlgmr.msra.gmra.mrb[24].mxu0 %v1234_v24  ;;  %1309 = vmatmul.mubr.bf16.vlgmr.msra.gmra.mrb[24].mxu1 %v1234_v24 }
 0x5c0   :  { %1371 = vmatpush1.bf16.msra.mxu0 %v2279_v36  ;;  %1412 = vmatpush1.bf16.msra.mxu1 %v2281_v37  ;;  %v2067_v36 = vld [vmem:[#allocation6 + $0x4] ss:$16 sps:$4 sm:$0xff]   ;;  %v2068_v37 = vld [vmem:[#allocation6 + $0xc] ss:$16 sps:$4 sm:$0xff]  }
 0x5c1   :  { %1372 = vmatprep.subr.bf16.mxu0 %v2283_v38  ;;  %1413 = vmatprep.subr.bf16.mxu1 %v2287_v39 }
 0x5c2   :  { %1402 = vmatprep.mubr.bf16.mxu0 %v2187_v0  ;;  %1443 = vmatprep.mubr.bf16.mxu1 %v2187_v0 }
 0x5c4   :  { %1373 = vmatpush1.bf16.msra.mxu0 %v2289_v40  ;;  %1414 = vmatpush1.bf16.msra.mxu1 %v2293_v41 }
 0x5c5   :  { %1374 = vmatprep.subr.bf16.mxu0 %v2297_v42  ;;  %1415 = vmatprep.subr.bf16.mxu1 %v2299_v43 }
 0x5c8   :  { %1375 = vmatpush1.bf16.msra.mxu0 %v2303_v44  ;;  %1416 = vmatpush1.bf16.msra.mxu1 %v2305_v45 }
 0x5c9   :  { %1376 = vmatprep.subr.bf16.mxu0 %v2309_v46  ;;  %1417 = vmatprep.subr.bf16.mxu1 %v2313_v47 }
 0x5cc   :  { %1377 = vmatpush1.bf16.msra.mxu0 %v2315_v48  ;;  %1418 = vmatpush1.bf16.msra.mxu1 %v2317_v49 }
 0x5cd   :  { %1378 = vmatprep.subr.bf16.mxu0 %v2319_v50  ;;  %1419 = vmatprep.subr.bf16.mxu1 %v2321_v51 }
 0x5d0   :  { %1379 = vmatpush1.bf16.msra.mxu0 %v2327_v52  ;;  %1420 = vmatpush1.bf16.msra.mxu1 %v2331_v53  ;;  %v1233_v52 = vld [vmem:[#allocation2 + $0x5] ss:$8 sm:$0xf] }
 0x5d1   :  { %1380 = vmatprep.subr.bf16.mxu0 %v2335_v54  ;;  %1421 = vmatprep.subr.bf16.mxu1 %v2337_v55 }
 0x5d4   :  { %1381 = vmatpush1.bf16.msra.mxu0 %v2341_v56  ;;  %1422 = vmatpush1.bf16.msra.mxu1 %v2343_v57 }
 0x5d5   :  { %1382 = vmatprep.subr.bf16.mxu0 %v2347_v58  ;;  %1423 = vmatprep.subr.bf16.mxu1 %v2349_v59 }
 0x5d8   :  { %1383 = vmatpush1.bf16.msra.mxu0 %v2353_v60  ;;  %1424 = vmatpush1.bf16.msra.mxu1 %v2355_v61 }
 0x5d9   :  { %1384 = vmatprep.subr.bf16.mxu0 %v2359_v62  ;;  %1425 = vmatprep.subr.bf16.mxu1 %v2361_v63 }
 0x5dc   :  { %1385 = vmatpush1.bf16.msra.mxu0 %v2365_v1  ;;  %1426 = vmatpush1.bf16.msra.mxu1 %v2367_v2 }
 0x5dd   :  { %1505 = vmatprep.subr.bf16.mxu0 %v2067_v36  ;;  %1546 = vmatprep.subr.bf16.mxu1 %v2068_v37 }
 0x692   :  { %v1269_v38 = vpop.f32.mrb[24].mxu0  ;;  %v1310_v39 = vpop.f32.mrb[24].mxu1 }
 0x693   :  { %v1271_v40 = vpop.f32.mrb[25].mxu0  ;;  %v1312_v41 = vpop.f32.mrb[25].mxu1 }
 0x694   :  { %v1321_v42 = vcombine.low %v1269_v38, %v1271_v40  ;;  %v1322_v43 = vcombine.low %v1310_v39, %v1312_v41  ;;  %v1273_v44 = vpop.f32.mrb[26].mxu0  ;;  %v1314_v45 = vpop.f32.mrb[26].mxu1 }
 0x695   :  { %v1274_v46 = vpop.f32.mrb[27].mxu0  ;;  %v1315_v47 = vpop.f32.mrb[27].mxu1 }
 0x696   :  { %v1329_v48 = vrot.slane %v1321_v42, %v2414_v29  ;;  %v1336_v49 = vrot.slane %v1322_v43, %v2414_v29 }
 0x698   :  { %v1337_v50 = vcombine.low %v1329_v48, %v1336_v49 }
 0x69a   :  { %v1344_v51 = vrot.slane %v1337_v50, %v2414_v29 }
 0x69c   :  { %v1346_v27 = vadd.f32 %v1344_v51, %v1233_v52  ;;  %v1991_v52 = vld [vmem:[#allocation8] sm:$0xff]  }
 0x69e   :  { %v1843_v25 = vmul.f32 -1.442695, %v1346_v27  ;;  %v1354_v32 = vrot.slane %v1346_v27, 3  ;;  %v2189_v27 = vmov 0.0  }
 0x6a0   :  { %2039 = vpow2.f32 %v1843_v25  ;;  %v1992_v25 = vld [vmem:[#allocation8 + $0x8] sm:$0xff]  }
 0x6aa   :  { %v2040_v26 = vpop.eup %2039 }
 0x6ab   :  { %v1350_v31 = vadd.f32 1.0, %v2040_v26  ;;  %v1993_v26 = vld [vmem:[#allocation8 + $0x10] sm:$0xff]  }
 0x6ad   :  { %2041 = vrcp.f32 %v1350_v31  ;;  %v1994_v31 = vld [vmem:[#allocation8 + $0x18] sm:$0xff]  }
 0x6ae   :  { %2043 = vtanh.f32 %v1354_v32  ;;  %v1995_v32 = vld [vmem:[#allocation8 + $0x20] sm:$0xff]  }
 0x6b7   :  { %v2042_v35 = vpop.eup %2041 }
 0x6b8   :  { %v1358_v3 = vrot.slane %v2042_v35, 1  ;;  %v2044_v5 = vpop.eup %2043  ;;  %v1364_v9 = vrot.slane %v2042_v35, 2 }
 0x6b9   :  { %v1361_v6 = vmul.f32 %v2044_v5, %v2042_v35  ;;  %v1996_v35 = vld [vmem:[#allocation8 + $0x28] sm:$0xff]   ;;  %v1998_v5 = vld [vmem:[#allocation8 + $0x38] sm:$0xff]  }
 0x6ba   :  { %v1360_v7 = vmul.f32 %v1358_v3, %v2583_v22  ;;  %v2081_v22 = vld [vmem:[#allocation6 + $0x60] ss:$16 sps:$4 sm:$0xff]  }
 0x6bb   :  { %v1997_v3 = vld [vmem:[#allocation8 + $0x30] sm:$0xff]  }
 0x6bc   :  { %v2622_v8 = vadd.f32 %v1361_v6, %v1360_v7 }
 0x6be   :  { %2045 = vtanh.f32 %v2622_v8 }
 0x6c8   :  { %v2046_v10 = vpop.eup %2045 }
 0x6c9   :  { %v1366_v11 = vmul.f32 %v2046_v10, %v1364_v9 }
 0x6cb   :  { %v1369_v12 = vpack.c.bf16 %v1366_v11, %v1366_v11 }
 0x6cd   :  { %1403 = vmatmul.mubr.bf16.vlgmr.msra.gmra.mrb[28].mxu0 %v1369_v12  ;;  %1444 = vmatmul.mubr.bf16.vlgmr.msra.gmra.mrb[28].mxu1 %v1369_v12 }
 0x6ce   :  { %1506 = vmatpush1.bf16.msra.mxu0 %v2069_v13  ;;  %1547 = vmatpush1.bf16.msra.mxu1 %v2070_v33 }
 0x6cf   :  { %1507 = vmatprep.subr.bf16.mxu0 %v2071_v14  ;;  %1548 = vmatprep.subr.bf16.mxu1 %v2072_v34 }
 0x6d0   :  { %1537 = vmatprep.mubr.bf16.mxu0 %v2187_v0  ;;  %1578 = vmatprep.mubr.bf16.mxu1 %v2187_v0  ;;  %v2083_v0 = vld [vmem:[#allocation6 + $0x84] ss:$16 sps:$4 sm:$0xff]  }
 0x6d2   :  { %1508 = vmatpush1.bf16.msra.mxu0 %v2073_v4  ;;  %1549 = vmatpush1.bf16.msra.mxu1 %v2074_v15 }
 0x6d3   :  { %1509 = vmatprep.subr.bf16.mxu0 %v2075_v16  ;;  %1550 = vmatprep.subr.bf16.mxu1 %v2076_v17  ;;  %v1503_v17 = vld [vmem:[#allocation2 + $0x7] ss:$8 sm:$0xf] }
 0x6d6   :  { %1510 = vmatpush1.bf16.msra.mxu0 %v2077_v18  ;;  %1551 = vmatpush1.bf16.msra.mxu1 %v2078_v19 }
 0x6d7   :  { %1511 = vmatprep.subr.bf16.mxu0 %v2079_v20  ;;  %1552 = vmatprep.subr.bf16.mxu1 %v2080_v21 }
 0x6da   :  { %1512 = vmatpush1.bf16.msra.mxu0 %v2081_v22  ;;  %1553 = vmatpush1.bf16.msra.mxu1 %v2082_v23 }
 0x6db   :  { %1513 = vmatprep.subr.bf16.mxu0 %v2083_v0  ;;  %1554 = vmatprep.subr.bf16.mxu1 %v2084_v28 }
 0x6de   :  { %1514 = vmatpush1.bf16.msra.mxu0 %v2085_v30  ;;  %1555 = vmatpush1.bf16.msra.mxu1 %v2331_v53 }
 0x6df   :  { %1515 = vmatprep.subr.bf16.mxu0 %v2335_v54  ;;  %1556 = vmatprep.subr.bf16.mxu1 %v2337_v55 }
 0x6e2   :  { %1516 = vmatpush1.bf16.msra.mxu0 %v2341_v56  ;;  %1557 = vmatpush1.bf16.msra.mxu1 %v2343_v57 }
 0x6e3   :  { %1517 = vmatprep.subr.bf16.mxu0 %v2347_v58  ;;  %1558 = vmatprep.subr.bf16.mxu1 %v2349_v59 }
 0x6e6   :  { %1518 = vmatpush1.bf16.msra.mxu0 %v2353_v60  ;;  %1559 = vmatpush1.bf16.msra.mxu1 %v2355_v61 }
 0x6e7   :  { %1519 = vmatprep.subr.bf16.mxu0 %v2359_v62  ;;  %1560 = vmatprep.subr.bf16.mxu1 %v2361_v63 }
 0x6ea   :  { %1520 = vmatpush1.bf16.msra.mxu0 %v2365_v1  ;;  %1561 = vmatpush1.bf16.msra.mxu1 %v2367_v2  ;;  %v1368_v1 = vld [vmem:[#allocation2 + $0x6] ss:$8 sm:$0xf] }
 0x6eb   :  { %1863 = vmatprep.subr.bf16.mxu0 %v2189_v27 }
 0x7a0   :  { %v1404_v53 = vpop.f32.mrb[28].mxu0  ;;  %v1445_v54 = vpop.f32.mrb[28].mxu1 }
 0x7a1   :  { %v1406_v55 = vpop.f32.mrb[29].mxu0  ;;  %v1447_v56 = vpop.f32.mrb[29].mxu1 }
 0x7a2   :  { %v1456_v57 = vcombine.low %v1404_v53, %v1406_v55  ;;  %v1457_v58 = vcombine.low %v1445_v54, %v1447_v56  ;;  %v1408_v24 = vpop.f32.mrb[30].mxu0  ;;  %v1449_v59 = vpop.f32.mrb[30].mxu1 }
 0x7a3   :  { %v1409_v36 = vpop.f32.mrb[31].mxu0  ;;  %v1450_v60 = vpop.f32.mrb[31].mxu1 }
 0x7a4   :  { %v1464_v61 = vrot.slane %v1456_v57, %v2414_v29  ;;  %v1471_v62 = vrot.slane %v1457_v58, %v2414_v29  ;;  %v1654_v58 = vld [vmem:[%s2667_s5] sm:$0x1]  ;;  %s2191_s5 = smov [#allocation9]  }
 0x7a5   :  { %s1764_s14 = sshll.u32 %s2191_s5, 4  ;;  %s1765_s14 = int_to_ptr.vmem [resolvable:$true] %s1764_s14 }
 0x7a6   :  { %v1472_v37 = vcombine.low %v1464_v61, %v1471_v62  ;;  %s2152_s15 = scalar_lea.vmem %s1765_s14, 16  ;;  %s2156_s16 = scalar_lea.vmem %s1765_s14, 32 }
 0x7a7   :  { %p2153_p10 = scmp.ne.s32.totalorder %s1765_s14, %s2152_s15  ;;  %p2157_p11 = scmp.lt.s32.totalorder %s1765_s14, %s1765_s14 }
 0x7a8   :  { %v1479_v63 = vrot.slane %v1472_v37, %v2414_v29  ;;  %p2158_p12 = scmp.lt.s32.totalorder %s2156_s16, %s2152_s15 }
 0x7aa   :  { %v1481_v38 = vadd.f32 %v1479_v63, %v1368_v1  ;;  %p2159_p13 = por %p2158_p12, %p2157_p11 }
 0x7ac   :  { %v1844_v2 = vmul.f32 -1.442695, %v1481_v38  ;;  %v1489_v41 = vrot.slane %v1481_v38, 3  ;;  %p2160_p0 = pnand %p2159_p13, %p2153_p10 }
 0x7ae   :  { %2047 = vpow2.f32 %v1844_v2 }
 0x7b8   :  { %v2048_v39 = vpop.eup %2047 }
 0x7b9   :  { %v1485_v40 = vadd.f32 1.0, %v2048_v39 }
 0x7bb   :  { %2049 = vrcp.f32 %v1485_v40 }
 0x7bc   :  { %2051 = vtanh.f32 %v1489_v41 }
 0x7c5   :  { %v2050_v42 = vpop.eup %2049 }
 0x7c6   :  { %v1493_v43 = vrot.slane %v2050_v42, 1  ;;  %v2052_v44 = vpop.eup %2051  ;;  %v1499_v48 = vrot.slane %v2050_v42, 2 }
 0x7c7   :  { %v1496_v45 = vmul.f32 %v2052_v44, %v2050_v42 }
 0x7c8   :  { %v1495_v46 = vmul.f32 %v1493_v43, %v2622_v8 }
 0x7ca   :  { %v1497_v47 = vadd.f32 %v1496_v45, %v1495_v46 }
 0x7cc   :  { %2053 = vtanh.f32 %v1497_v47 }
 0x7d6   :  { %v2054_v49 = vpop.eup %2053 }
 0x7d7   :  { %v1501_v50 = vmul.f32 %v2054_v49, %v1499_v48 }
 0x7d9   :  { %v1504_v51 = vpack.c.bf16 %v1501_v50, %v1501_v50 }
 0x7db   :  { %1538 = vmatmul.mubr.bf16.vlgmr.msra.gmra.mrb[32].mxu0 %v1504_v51  ;;  %1579 = vmatmul.mubr.bf16.vlgmr.msra.gmra.mrb[32].mxu1 %v1504_v51 }
 0x7dc   :  { %1879 = vmatprep.mubr.msk.bf16.mxu0 %vm2190_vm0, %v2189_v27  ;;  %1864 = vmatpush3.bf16.msra.mxu0 %v1991_v52 }
 0x7dd   :  { %1865 = vmatprep.subr.bf16.mxu0 %v2189_v27 }
 0x7e0   :  { %1866 = vmatpush3.bf16.msra.mxu0 %v1992_v25 }
 0x7e1   :  { %1867 = vmatprep.subr.bf16.mxu0 %v2189_v27 }
 0x7e4   :  { %1868 = vmatpush3.bf16.msra.mxu0 %v1993_v26 }
 0x7e5   :  { %1869 = vmatprep.subr.bf16.mxu0 %v2189_v27 }
 0x7e8   :  { %1870 = vmatpush3.bf16.msra.mxu0 %v1994_v31 }
 0x7e9   :  { %1871 = vmatprep.subr.bf16.mxu0 %v2189_v27 }
 0x7ec   :  { %1872 = vmatpush3.bf16.msra.mxu0 %v1995_v32 }
 0x7ed   :  { %1873 = vmatprep.subr.bf16.mxu0 %v2189_v27 }
 0x7f0   :  { %1874 = vmatpush3.bf16.msra.mxu0 %v1996_v35 }
 0x7f1   :  { %1875 = vmatprep.subr.bf16.mxu0 %v2189_v27 }
 0x7f4   :  { %1876 = vmatpush3.bf16.msra.mxu0 %v1997_v3 }
 0x7f5   :  { %1877 = vmatprep.subr.bf16.mxu0 %v2189_v27 }
 0x7f8   :  { %1878 = vmatpush3.bf16.msra.mxu0 %v1998_v5 }
 0x8ae   :  { %v1539_v6 = vpop.f32.mrb[32].mxu0  ;;  %v1580_v7 = vpop.f32.mrb[32].mxu1 }
 0x8af   :  { %v1541_v8 = vpop.f32.mrb[33].mxu0  ;;  %v1582_v9 = vpop.f32.mrb[33].mxu1 }
 0x8b0   :  { %v1591_v10 = vcombine.low %v1539_v6, %v1541_v8  ;;  %v1592_v11 = vcombine.low %v1580_v7, %v1582_v9  ;;  %v1543_v12 = vpop.f32.mrb[34].mxu0  ;;  %v1584_v13 = vpop.f32.mrb[34].mxu1 }
 0x8b1   :  { %v1544_v33 = vpop.f32.mrb[35].mxu0  ;;  %v1585_v14 = vpop.f32.mrb[35].mxu1 }
 0x8b2   :  { %v1599_v34 = vrot.slane %v1591_v10, %v2414_v29  ;;  %v1606_v4 = vrot.slane %v1592_v11, %v2414_v29 }
 0x8b4   :  { %v1607_v15 = vcombine.low %v1599_v34, %v1606_v4 }
 0x8b6   :  { %v1614_v16 = vrot.slane %v1607_v15, %v2414_v29 }
 0x8b8   :  { %v1616_v18 = vadd.f32 %v1614_v16, %v1503_v17 }
 0x8ba   :  { %v1845_v19 = vmul.f32 -1.442695, %v1616_v18  ;;  %v1624_v22 = vrot.slane %v1616_v18, 3 }
 0x8bc   :  { %2055 = vpow2.f32 %v1845_v19 }
 0x8c6   :  { %v2056_v20 = vpop.eup %2055 }
 0x8c7   :  { %v1620_v21 = vadd.f32 1.0, %v2056_v20 }
 0x8c9   :  { %2057 = vrcp.f32 %v1620_v21 }
 0x8ca   :  { %2059 = vtanh.f32 %v1624_v22 }
 0x8d3   :  { %v2058_v23 = vpop.eup %2057 }
 0x8d4   :  { %v1628_v0 = vrot.slane %v2058_v23, 1  ;;  %v2060_v28 = vpop.eup %2059  ;;  %v1634_v55 = vrot.slane %v2058_v23, 2 }
 0x8d5   :  { %v1631_v53 = vmul.f32 %v2060_v28, %v2058_v23 }
 0x8d6   :  { %v1630_v30 = vmul.f32 %v1628_v0, %v1497_v47 }
 0x8d8   :  { %v1632_v54 = vadd.f32 %v1631_v53, %v1630_v30 }
 0x8da   :  { %2061 = vtanh.f32 %v1632_v54 }
 0x8e4   :  { %v2062_v56 = vpop.eup %2061 }
 0x8e5   :  { %v1636_v57 = vmul.f32 %v2062_v56, %v1634_v55 }
 0x8e7   :  { %v1637_v29 = vpack.c.bf16 %v1636_v57, %v1636_v57 }
 0x8e9   :  { %1880 = vmatmul.mubr.bf16.vlgmr.msra.gmra.mrb[36].mxu0 %v1637_v29 }
 0x9bc   :  { %v1737_v24 = vpop.f32.mrb[36].mxu0 }
 0x9bd   :  { %v1738_v59 = vadd.f32 %v1737_v24, %v1654_v58  ;;  %v1881_v36 = vpop.f32.mrb[37].mxu0 }
 0x9be   :  { %v1740_v60 = vpop.f32.mrb[38].mxu0 }
 0x9bf   :  { %v1882_v61 = vpop.f32.mrb[39].mxu0  ;;  %v1744_v62 = vsel %vm1743_vm1, %v1738_v59, -inf }
 0x9c0   :  { %1745 = vmax.xlane.f32.xlu0 %v1744_v62 }
 0xa4d   :  { %v1746_v37 = vpop.xlane.xlu0 %1745 }
 0xa4e   :  { %v1747_v63 = vsub.f32 %v1738_v59, %v1746_v37 }
 0xa50   :  { %v1748_v1 = vmul.f32 1.442695, %v1747_v63 }
 0xa52   :  { %2063 = vpow2.f32 %v1748_v1 }
 0xa5c   :  { %v2064_v38 = vpop.eup %2063 }
 0xa5d   :  { %v1750_v2 = vsel %vm1743_vm1, %v2064_v38, 0.0 }
 0xa5e   :  { %1751 = vadd.xlane.f32.xlu0 %v1750_v2 }
 0xaeb   :  { %v1752_v39 = vpop.xlane.xlu0 %1751 }
 0xaec   :  { %2065 = vlog2.f32 %v1752_v39 }
 0xaf6   :  { %v2066_v40 = vpop.eup %2065 }
 0xaf7   :  { %v1754_v41 = vmul.f32 0.6931472, %v2066_v40 }
 0xaf9   :  { %v1755_v42 = vadd.f32 %v1754_v41, %v1746_v37 }
 0xafb   :  { %v1756_v43 = vsub.f32 %v1738_v59, %v1755_v42 }
 0xafd   :  { %1757 = vst [vmem:[#allocation9] sm:$0x1] %v1756_v43 }
 0xafe   :  { %2163 = shalt.err (!%p2160_p0)
}
 0xaff   :  { %s2164_s19 = scalar_lea.hbm %s2668_s6, 16 }
 0xb00   :  { %p2165_p1 = scmp.ne.s32.totalorder %s2668_s6, %s2164_s19  ;;  %p2168_p2 = scmp.lt.u32.totalorder %s2164_s19, %s2668_s6 }
 0xb02   :  { %p2170_p3 = pnand %p2168_p2, %p2165_p1 }
 0xb04   :  { %2173 = shalt.err (!%p2170_p3)
}
 0xb05   :  { %1767 = dma.vmem_to_hbm [thread:$0]  %s1765_s14, 16, %s2668_s6, [#allocation5]  }
 0xb06   :  { %2178 = dma.done.wait [#allocation5], 16  }
 0xb07   :  { %2179 = vsyncadd [#allocation5], 4294967280 }
 0xb08   :  { %1771 = vsyncpa [#allocation4], 1 }
 0xb09   :  { %1772 = vsyncpa [#allocation7], 1 }
 0xb0a   :  { %1773 = vsyncpa [#allocation5], 1 }

</bundles_post_ra>
